<compile_context>
chip_gen: v7x
topology: tpu7x:2x2x1
jax: 0.10.0
libtpu: 0.0.40
codegen_flags: <defaults>
</compile_context>

<pallas_src>
import numpy as np
import jax
import jax.numpy as jnp
from jax.experimental import pallas as pl
from jax.experimental.pallas import tpu as pltpu

DIM_X = 2
DIM_Z = 4
HIDDEN = 100              # module's hidden size
H_PAD = 128               # lane/sublane-dense hidden size
DOUT = DIM_Z              # 4 output channels
NN_SCALE = 2500.0


def _elu(h):
    # PyTorch ELU (alpha=1): x if x>0 else exp(x)-1
    return jnp.where(h > 0, h, jnp.exp(jnp.minimum(h, 0.0)) - 1.0)


def greybox_kernel(phys_ref,             # SMEM (3,) f32: [1/C2, 1/L1, R1/L1]
                   xT_ref,               # VMEM (2, TB) f32  [v_IN; i_OUT]
                   zT_ref,               # VMEM (4, TB) f32  [v_OUT; i_IN; v_INT; i_INT]
                   w1x_ref, w1z_ref,     # VMEM (128, 2) bf16, (128, 4) bf16
                   b1_ref,               # VMEM (128, 1) f32
                   w2_ref, b2_ref,       # VMEM (128, 128) bf16, (128, 1) f32
                   w3_ref, b3_ref,       # VMEM (2, 128) bf16 (x2500 folded), (2, 1) f32 (x2500)
                   o_ref):               # VMEM (4, TB) f32
    xT = xT_ref[...]                                              # (2, TB) f32
    zT = zT_ref[...]                                              # (4, TB) f32

    # ---- Unknown part: MLP in feature-major layout, bf16 MXU / f32 acc ------
    x_bf = xT.astype(jnp.bfloat16)
    z_bf = zT.astype(jnp.bfloat16)
    h1 = _elu(jnp.dot(w1x_ref[...], x_bf, preferred_element_type=jnp.float32)
              + jnp.dot(w1z_ref[...], z_bf, preferred_element_type=jnp.float32)
              + b1_ref[...])                                      # (128, TB) f32
    h2 = _elu(jnp.dot(w2_ref[...], h1.astype(jnp.bfloat16),
                      preferred_element_type=jnp.float32)
              + b2_ref[...])                                      # (128, TB) f32
    nn_out = (jnp.dot(w3_ref[...], h2.astype(jnp.bfloat16),
                      preferred_element_type=jnp.float32)
              + b3_ref[...])                                      # (2, TB) f32, *2500 folded

    # ---- Known physics: exact f32 multiply-adds on the VPU ------------------
    inv_C2 = phys_ref[0]
    inv_L1 = phys_ref[1]
    r1_over_l1 = phys_ref[2]
    # d_v_OUT/dt = i_INT/C2 - i_OUT/C2
    d_v_out = (zT[3:4, :] - xT[1:2, :]) * inv_C2                  # (1, TB)
    # d_i_IN/dt = v_IN/L1 - R1*i_IN/L1 - v_INT/L1
    d_i_in = (xT[0:1, :] - zT[2:3, :]) * inv_L1 - zT[1:2, :] * r1_over_l1

    # Single lane-dense store of the full (4, TB) tile.
    o_ref[...] = jnp.concatenate([d_v_out, d_i_in, nn_out], axis=0)


def pack_weights(params, w1, b1, w2, b2, w3, b3):
    """One-time host-side transpose / padding / constant folding into kernel layouts."""
    C2, R1, L1 = [np.float64(v) for v in np.asarray(params)]
    phys = np.array([1.0 / C2, 1.0 / L1, R1 / L1], dtype=np.float32)

    # Layer 1: (in=6, out=100) -> (out, in) padded to 128 rows, split x / z cols.
    w1t = np.zeros((H_PAD, DIM_X + DIM_Z), np.float32)
    w1t[:HIDDEN, :] = np.asarray(w1, np.float32).T
    w1x = w1t[:, :DIM_X]                                  # (128, 2)
    w1z = w1t[:, DIM_X:]                                  # (128, 4)
    b1p = np.zeros((H_PAD, 1), np.float32)
    b1p[:HIDDEN, 0] = np.asarray(b1, np.float32).reshape(-1)

    # Layer 2: (100,100) -> (out, in) zero-padded to (128,128).
    w2t = np.zeros((H_PAD, H_PAD), np.float32)
    w2t[:HIDDEN, :HIDDEN] = np.asarray(w2, np.float32).T
    b2p = np.zeros((H_PAD, 1), np.float32)
    b2p[:HIDDEN, 0] = np.asarray(b2, np.float32).reshape(-1)

    # Head: (100, 2) -> (2, 128), *2500 scale folded in; bias scaled, kept f32.
    w3t = np.zeros((2, H_PAD), np.float32)
    w3t[:, :HIDDEN] = np.asarray(w3, np.float32).T * NN_SCALE
    b3p = (np.asarray(b3, np.float32).reshape(2, 1) * NN_SCALE).astype(np.float32)

    return (jnp.asarray(phys),
            jnp.asarray(w1x, jnp.bfloat16), jnp.asarray(w1z, jnp.bfloat16),
            jnp.asarray(b1p),
            jnp.asarray(w2t, jnp.bfloat16), jnp.asarray(b2p),
            jnp.asarray(w3t, jnp.bfloat16), jnp.asarray(b3p))


def greybox_forward_t(xT, zT, packed, *, tb=1024):
    """dz/dt = f(z, x) for a batch of states, feature-major in/out.

    xT: (2, B) = [v_IN; i_OUT], zT: (4, B) = [v_OUT; i_IN; v_INT; i_INT]
    returns (4, B) = [d_v_OUT; d_i_IN; nn0; nn1]

    tb is the main tunable: sweep 1024-4096 on v7x (keep >= 2 tiles so the
    batch shards across both TensorCores); on single-TC v5e/v6e push to ~8192.
    """
    assert tb % 128 == 0, "batch tile must be a multiple of 128 lanes"
    phys, w1x, w1z, b1, w2, b2, w3, b3 = packed
    B = xT.shape[1]
    Bp = pl.cdiv(B, tb) * tb
    if Bp != B:
        xT = jnp.pad(xT, ((0, 0), (0, Bp - B)))
        zT = jnp.pad(zT, ((0, 0), (0, Bp - B)))

    out = pl.pallas_call(
        greybox_kernel,
        out_shape=jax.ShapeDtypeStruct((DOUT, Bp), jnp.float32),
        grid_spec=pltpu.PrefetchScalarGridSpec(
            num_scalar_prefetch=0,
            grid=(Bp // tb,),
            in_specs=[
                pl.BlockSpec(memory_space=pltpu.MemorySpace.SMEM),   # phys (3,)
                pl.BlockSpec((DIM_X, tb), lambda i: (0, i)),         # xT (batch-tiled)
                pl.BlockSpec((DIM_Z, tb), lambda i: (0, i)),         # zT (batch-tiled)
                pl.BlockSpec((H_PAD, DIM_X), lambda i: (0, 0)),      # w1x (resident)
                pl.BlockSpec((H_PAD, DIM_Z), lambda i: (0, 0)),      # w1z
                pl.BlockSpec((H_PAD, 1), lambda i: (0, 0)),          # b1
                pl.BlockSpec((H_PAD, H_PAD), lambda i: (0, 0)),      # w2
                pl.BlockSpec((H_PAD, 1), lambda i: (0, 0)),          # b2
                pl.BlockSpec((2, H_PAD), lambda i: (0, 0)),          # w3 (scaled)
                pl.BlockSpec((2, 1), lambda i: (0, 0)),              # b3 (scaled)
            ],
            out_specs=pl.BlockSpec((DOUT, tb), lambda i: (0, i)),
        ),
        compiler_params=pltpu.CompilerParams(
            dimension_semantics=("parallel",)),
    )(phys, xT, zT, w1x, w1z, b1, w2, b2, w3, b3)
    return out[:, :B]


def greybox_forward(x, z, packed, *, tb=1024):
    """Row-major drop-in matching the module interface: x (B,2), z (B,4) -> (B,4).

    In the ODE-integrator use case keep state feature-major and call
    greybox_forward_t directly to avoid these boundary transposes.
    """
    return greybox_forward_t(x.T, z.T, packed, tb=tb).T


def reference_forward(params, x, z, w1, b1, w2, b2, w3, b3):
    """Pure-JAX reference, faithful to the PyTorch module (unpadded f32 weights)."""
    C2, R1, L1 = params[0], params[1], params[2]
    v_IN, i_OUT = x[:, 0], x[:, 1]
    i_IN, v_INT, i_INT = z[:, 1], z[:, 2], z[:, 3]
    d_i_IN_dt = v_IN / L1 - R1 * i_IN / L1 - v_INT / L1
    d_v_OUT_dt = i_INT / C2 - i_OUT / C2
    z_known = jnp.stack([d_v_OUT_dt, d_i_IN_dt], axis=-1)
    xz = jnp.concatenate([x, z], axis=-1)
    h1 = _elu(xz @ w1 + b1.reshape(-1))
    h2 = _elu(h1 @ w2 + b2.reshape(-1))
    z_unknown = (h2 @ w3 + b3.reshape(-1)) * NN_SCALE
    return jnp.concatenate([z_known, z_unknown], axis=-1)


def init_params():
    """Deterministic parameter init mirroring the module's __init__."""
    def inv_softplus(y):
        return np.log(np.expm1(y))

    def softplus(y):
        return np.log1p(np.exp(y))

    # Physical params: inverse_softplus at init, softplus in forward (float64
    # round-trip like PyTorch, then cast to f32).
    C2 = softplus(inv_softplus(np.float64(100e-6)))
    R1 = softplus(inv_softplus(np.float64(50 * 0.001)))
    L1 = softplus(inv_softplus(np.float64(1e-6)))
    params = jnp.array([C2, R1, L1], dtype=jnp.float32)

    # MLP weights: PyTorch Linear default init, U(-1/sqrt(fan_in), 1/sqrt(fan_in)).
    key = jax.random.PRNGKey(42)
    ks = jax.random.split(key, 6)

    def uinit(k, shape, fan_in):
        bound = 1.0 / np.sqrt(fan_in)
        return jax.random.uniform(k, shape, jnp.float32, -bound, bound)

    din = DIM_X + DIM_Z
    w1 = uinit(ks[0], (din, HIDDEN), din)
    b1 = uinit(ks[1], (1, HIDDEN), din)
    w2 = uinit(ks[2], (HIDDEN, HIDDEN), HIDDEN)
    b2 = uinit(ks[3], (1, HIDDEN), HIDDEN)
    w3 = uinit(ks[4], (HIDDEN, 2), HIDDEN)
    b3 = uinit(ks[5], (1, 2), HIDDEN)
    return params, (w1, b1, w2, b2, w3, b3)


if __name__ == "__main__":
    B = 512     # small demo batch; two TB=256 tiles exercises the parallel grid
    TB = 256
    key = jax.random.PRNGKey(0)
    kx, kz = jax.random.split(key)
    # Feature-major inputs: xT = [v_IN; i_OUT], zT = [v_OUT; i_IN; v_INT; i_INT]
    xT = jax.random.normal(kx, (DIM_X, B), jnp.float32)
    zT = jax.random.normal(kz, (DIM_Z, B), jnp.float32)

    params, (w1, b1, w2, b2, w3, b3) = init_params()
    packed = pack_weights(params, w1, b1, w2, b2, w3, b3)

    out_t = jax.block_until_ready(greybox_forward_t(xT, zT, packed, tb=TB))
    assert out_t.shape == (DOUT, B), out_t.shape

    ref = jax.block_until_ready(
        reference_forward(params, xT.T, zT.T, w1, b1, w2, b2, w3, b3))  # (B, 4)

    out = np.asarray(out_t).T          # (B, 4) for comparison
    ref = np.asarray(ref)

    # Physics columns run on an exact-f32 VPU path (only association /
    # reciprocal-vs-divide rounding vs the reference) -> tight tolerance.
    np.testing.assert_allclose(out[:, :2], ref[:, :2], rtol=1e-5, atol=2.0)
    # NN head columns: bf16 MXU operands with the x2500 scale folded in.
    np.testing.assert_allclose(out[:, 2:], ref[:, 2:], rtol=1e-2, atol=5.0)

    # Row-major drop-in wrapper (module-style interface) is bit-identical.
    out_rm = jax.block_until_ready(greybox_forward(xT.T, zT.T, packed, tb=TB))
    np.testing.assert_array_equal(np.asarray(out_rm), out)

    print("KERNEL_OK")
</pallas_src>

<mosaic_0001>
module attributes {stable_mosaic.version = 11 : i64} {
  func.func @greybox_kernel(%arg0: i32, %arg1: memref<3xf32, #tpu.memory_space<smem>>, %arg2: memref<2x256xf32, #tpu.memory_space<vmem>>, %arg3: memref<4x256xf32, #tpu.memory_space<vmem>>, %arg4: memref<128x2xbf16, #tpu.memory_space<vmem>>, %arg5: memref<128x4xbf16, #tpu.memory_space<vmem>>, %arg6: memref<128x1xf32, #tpu.memory_space<vmem>>, %arg7: memref<128x128xbf16, #tpu.memory_space<vmem>>, %arg8: memref<128x1xf32, #tpu.memory_space<vmem>>, %arg9: memref<2x128xbf16, #tpu.memory_space<vmem>>, %arg10: memref<2x1xf32, #tpu.memory_space<vmem>>, %arg11: memref<4x256xf32, #tpu.memory_space<vmem>>) attributes {dimension_semantics = [#tpu.dimension_semantics<parallel>], iteration_bounds = array<i64: 2>, scalar_prefetch = 0 : i64, scratch_operands = 0 : i64, tpu.core_type = #tpu.core_type<tc>, window_params = [{transform_indices = @transform_0, window_bounds = array<i64: 3>}, {transform_indices = @transform_1, window_bounds = array<i64: 2, 256>}, {transform_indices = @transform_2, window_bounds = array<i64: 4, 256>}, {pipeline_mode = #tpu.pipeline_mode<synchronous>, transform_indices = @transform_3, window_bounds = array<i64: 128, 2>}, {pipeline_mode = #tpu.pipeline_mode<synchronous>, transform_indices = @transform_4, window_bounds = array<i64: 128, 4>}, {pipeline_mode = #tpu.pipeline_mode<synchronous>, transform_indices = @transform_5, window_bounds = array<i64: 128, 1>}, {pipeline_mode = #tpu.pipeline_mode<synchronous>, transform_indices = @transform_6, window_bounds = array<i64: 128, 128>}, {pipeline_mode = #tpu.pipeline_mode<synchronous>, transform_indices = @transform_7, window_bounds = array<i64: 128, 1>}, {pipeline_mode = #tpu.pipeline_mode<synchronous>, transform_indices = @transform_8, window_bounds = array<i64: 2, 128>}, {pipeline_mode = #tpu.pipeline_mode<synchronous>, transform_indices = @transform_9, window_bounds = array<i64: 2, 1>}, {transform_indices = @transform_10, window_bounds = array<i64: 4, 256>}]} {
    %c0 = arith.constant 0 : index
    %c0_0 = arith.constant 0 : index
    %0 = vector.load %arg2[%c0, %c0_0] : memref<2x256xf32, #tpu.memory_space<vmem>>, vector<2x256xf32>
    %c0_1 = arith.constant 0 : index
    %c0_2 = arith.constant 0 : index
    %1 = vector.load %arg3[%c0_1, %c0_2] : memref<4x256xf32, #tpu.memory_space<vmem>>, vector<4x256xf32>
    %2 = arith.truncf %0 : vector<2x256xf32> to vector<2x256xbf16>
    %3 = arith.truncf %1 : vector<4x256xf32> to vector<4x256xbf16>
    %c0_3 = arith.constant 0 : index
    %c0_4 = arith.constant 0 : index
    %4 = vector.load %arg4[%c0_3, %c0_4] : memref<128x2xbf16, #tpu.memory_space<vmem>>, vector<128x2xbf16>
    %cst = arith.constant dense<0.000000e+00> : vector<128x256xf32>
    %5 = tpu.matmul %4, %2, %cst {dimension_numbers = #tpu.dot_dimension_numbers<[1], [0], [0], [1], [0, 0, 1, 1], [], []>} : vector<128x2xbf16>, vector<2x256xbf16>, vector<128x256xf32> -> vector<128x256xf32>
    %c0_5 = arith.constant 0 : index
    %c0_6 = arith.constant 0 : index
    %6 = vector.load %arg5[%c0_5, %c0_6] : memref<128x4xbf16, #tpu.memory_space<vmem>>, vector<128x4xbf16>
    %cst_7 = arith.constant dense<0.000000e+00> : vector<128x256xf32>
    %7 = tpu.matmul %6, %3, %cst_7 {dimension_numbers = #tpu.dot_dimension_numbers<[1], [0], [0], [1], [0, 0, 1, 1], [], []>} : vector<128x4xbf16>, vector<4x256xbf16>, vector<128x256xf32> -> vector<128x256xf32>
    %8 = arith.addf %5, %7 : vector<128x256xf32>
    %c0_8 = arith.constant 0 : index
    %c0_9 = arith.constant 0 : index
    %9 = vector.load %arg6[%c0_8, %c0_9] : memref<128x1xf32, #tpu.memory_space<vmem>>, vector<128x1xf32>
    %10 = vector.broadcast %9 : vector<128x1xf32> to vector<128x256xf32>
    %11 = arith.addf %8, %10 : vector<128x256xf32>
    %cst_10 = arith.constant 0.000000e+00 : f32
    %12 = vector.broadcast %cst_10 : f32 to vector<128x256xf32>
    %13 = arith.cmpf ogt, %11, %12 : vector<128x256xf32>
    %cst_11 = arith.constant 0.000000e+00 : f32
    %14 = vector.broadcast %cst_11 : f32 to vector<128x256xf32>
    %15 = arith.minimumf %11, %14 : vector<128x256xf32>
    %16 = math.exp %15 : vector<128x256xf32>
    %cst_12 = arith.constant 1.000000e+00 : f32
    %17 = vector.broadcast %cst_12 : f32 to vector<128x256xf32>
    %18 = arith.subf %16, %17 : vector<128x256xf32>
    %19 = arith.select %13, %11, %18 : vector<128x256xi1>, vector<128x256xf32>
    %c0_13 = arith.constant 0 : index
    %c0_14 = arith.constant 0 : index
    %20 = vector.load %arg7[%c0_13, %c0_14] : memref<128x128xbf16, #tpu.memory_space<vmem>>, vector<128x128xbf16>
    %21 = arith.truncf %19 : vector<128x256xf32> to vector<128x256xbf16>
    %cst_15 = arith.constant dense<0.000000e+00> : vector<128x256xf32>
    %22 = tpu.matmul %20, %21, %cst_15 {dimension_numbers = #tpu.dot_dimension_numbers<[1], [0], [0], [1], [0, 0, 1, 1], [], []>} : vector<128x128xbf16>, vector<128x256xbf16>, vector<128x256xf32> -> vector<128x256xf32>
    %c0_16 = arith.constant 0 : index
    %c0_17 = arith.constant 0 : index
    %23 = vector.load %arg8[%c0_16, %c0_17] : memref<128x1xf32, #tpu.memory_space<vmem>>, vector<128x1xf32>
    %24 = vector.broadcast %23 : vector<128x1xf32> to vector<128x256xf32>
    %25 = arith.addf %22, %24 : vector<128x256xf32>
    %cst_18 = arith.constant 0.000000e+00 : f32
    %26 = vector.broadcast %cst_18 : f32 to vector<128x256xf32>
    %27 = arith.cmpf ogt, %25, %26 : vector<128x256xf32>
    %cst_19 = arith.constant 0.000000e+00 : f32
    %28 = vector.broadcast %cst_19 : f32 to vector<128x256xf32>
    %29 = arith.minimumf %25, %28 : vector<128x256xf32>
    %30 = math.exp %29 : vector<128x256xf32>
    %cst_20 = arith.constant 1.000000e+00 : f32
    %31 = vector.broadcast %cst_20 : f32 to vector<128x256xf32>
    %32 = arith.subf %30, %31 : vector<128x256xf32>
    %33 = arith.select %27, %25, %32 : vector<128x256xi1>, vector<128x256xf32>
    %c0_21 = arith.constant 0 : index
    %c0_22 = arith.constant 0 : index
    %34 = vector.load %arg9[%c0_21, %c0_22] : memref<2x128xbf16, #tpu.memory_space<vmem>>, vector<2x128xbf16>
    %35 = arith.truncf %33 : vector<128x256xf32> to vector<128x256xbf16>
    %cst_23 = arith.constant dense<0.000000e+00> : vector<2x256xf32>
    %36 = tpu.matmul %34, %35, %cst_23 {dimension_numbers = #tpu.dot_dimension_numbers<[1], [0], [0], [1], [0, 0, 1, 1], [], []>} : vector<2x128xbf16>, vector<128x256xbf16>, vector<2x256xf32> -> vector<2x256xf32>
    %c0_24 = arith.constant 0 : index
    %c0_25 = arith.constant 0 : index
    %37 = vector.load %arg10[%c0_24, %c0_25] : memref<2x1xf32, #tpu.memory_space<vmem>>, vector<2x1xf32>
    %38 = vector.broadcast %37 : vector<2x1xf32> to vector<2x256xf32>
    %39 = arith.addf %36, %38 : vector<2x256xf32>
    %c0_26 = arith.constant 0 : index
    %40 = memref.load %arg1[%c0_26] : memref<3xf32, #tpu.memory_space<smem>>
    %c1 = arith.constant 1 : index
    %41 = memref.load %arg1[%c1] : memref<3xf32, #tpu.memory_space<smem>>
    %c2 = arith.constant 2 : index
    %42 = memref.load %arg1[%c2] : memref<3xf32, #tpu.memory_space<smem>>
    %43 = vector.extract_strided_slice %1 {offsets = [3, 0], sizes = [1, 256], strides = [1, 1]} : vector<4x256xf32> to vector<1x256xf32>
    %44 = vector.extract_strided_slice %0 {offsets = [1, 0], sizes = [1, 256], strides = [1, 1]} : vector<2x256xf32> to vector<1x256xf32>
    %45 = arith.subf %43, %44 : vector<1x256xf32>
    %46 = vector.broadcast %40 : f32 to vector<1x256xf32>
    %47 = arith.mulf %45, %46 : vector<1x256xf32>
    %48 = vector.extract_strided_slice %0 {offsets = [0, 0], sizes = [1, 256], strides = [1, 1]} : vector<2x256xf32> to vector<1x256xf32>
    %49 = vector.extract_strided_slice %1 {offsets = [2, 0], sizes = [1, 256], strides = [1, 1]} : vector<4x256xf32> to vector<1x256xf32>
    %50 = arith.subf %48, %49 : vector<1x256xf32>
    %51 = vector.broadcast %41 : f32 to vector<1x256xf32>
    %52 = arith.mulf %50, %51 : vector<1x256xf32>
    %53 = vector.extract_strided_slice %1 {offsets = [1, 0], sizes = [1, 256], strides = [1, 1]} : vector<4x256xf32> to vector<1x256xf32>
    %54 = vector.broadcast %42 : f32 to vector<1x256xf32>
    %55 = arith.mulf %53, %54 : vector<1x256xf32>
    %56 = arith.subf %52, %55 : vector<1x256xf32>
    %57 = tpu.concatenate %47, %56, %39 in 0 : vector<1x256xf32>, vector<1x256xf32>, vector<2x256xf32> -> vector<4x256xf32>
    %c0_27 = arith.constant 0 : index
    %c0_28 = arith.constant 0 : index
    %58 = vector.load %arg11[%c0_27, %c0_28] : memref<4x256xf32, #tpu.memory_space<vmem>>, vector<4x256xf32>
    tpu.vector_store %arg11[%c0_27, %c0_28], %57 {strides = array<i32>} : memref<4x256xf32, #tpu.memory_space<vmem>>, vector<4x256xf32>,
    return
  }
  func.func @transform_0(%arg0: i32) -> i32 {
    %c0_i32 = arith.constant 0 : i32
    %c0_i32_0 = arith.constant 0 : i32
    return %c0_i32 : i32
  }
  func.func @transform_1(%arg0: i32) -> (i32, i32) {
    %c0_i32 = arith.constant 0 : i32
    %c0_i32_0 = arith.constant 0 : i32
    return %c0_i32, %arg0 : i32, i32
  }
  func.func @transform_2(%arg0: i32) -> (i32, i32) {
    %c0_i32 = arith.constant 0 : i32
    %c0_i32_0 = arith.constant 0 : i32
    return %c0_i32, %arg0 : i32, i32
  }
  func.func @transform_3(%arg0: i32) -> (i32, i32) {
    %c0_i32 = arith.constant 0 : i32
    %c0_i32_0 = arith.constant 0 : i32
    %c0_i32_1 = arith.constant 0 : i32
    return %c0_i32, %c0_i32_0 : i32, i32
  }
  func.func @transform_4(%arg0: i32) -> (i32, i32) {
    %c0_i32 = arith.constant 0 : i32
    %c0_i32_0 = arith.constant 0 : i32
    %c0_i32_1 = arith.constant 0 : i32
    return %c0_i32, %c0_i32_0 : i32, i32
  }
  func.func @transform_5(%arg0: i32) -> (i32, i32) {
    %c0_i32 = arith.constant 0 : i32
    %c0_i32_0 = arith.constant 0 : i32
    %c0_i32_1 = arith.constant 0 : i32
    return %c0_i32, %c0_i32_0 : i32, i32
  }
  func.func @transform_6(%arg0: i32) -> (i32, i32) {
    %c0_i32 = arith.constant 0 : i32
    %c0_i32_0 = arith.constant 0 : i32
    %c0_i32_1 = arith.constant 0 : i32
    return %c0_i32, %c0_i32_0 : i32, i32
  }
  func.func @transform_7(%arg0: i32) -> (i32, i32) {
    %c0_i32 = arith.constant 0 : i32
    %c0_i32_0 = arith.constant 0 : i32
    %c0_i32_1 = arith.constant 0 : i32
    return %c0_i32, %c0_i32_0 : i32, i32
  }
  func.func @transform_8(%arg0: i32) -> (i32, i32) {
    %c0_i32 = arith.constant 0 : i32
    %c0_i32_0 = arith.constant 0 : i32
    %c0_i32_1 = arith.constant 0 : i32
    return %c0_i32, %c0_i32_0 : i32, i32
  }
  func.func @transform_9(%arg0: i32) -> (i32, i32) {
    %c0_i32 = arith.constant 0 : i32
    %c0_i32_0 = arith.constant 0 : i32
    %c0_i32_1 = arith.constant 0 : i32
    return %c0_i32, %c0_i32_0 : i32, i32
  }
  func.func @transform_10(%arg0: i32) -> (i32, i32) {
    %c0_i32 = arith.constant 0 : i32
    %c0_i32_0 = arith.constant 0 : i32
    return %c0_i32, %arg0 : i32, i32
  }
}

</mosaic_0001>

<bundles_post_ra>
// kernel: tpu_custom_call.1
= control target key start
LH: loop header
LB: loop body
LE: loop exit
PB: predicated region body
PF: predicated region fallthrough
CT: control target
= control target key end

     0   :  { %s3070_s0 = inlined_call_operand.vmem [shape: f32[3], index: 0, kind: input, shape index: {}]   ;;  %s3071_s1 = inlined_call_operand.vmem [shape: f32[2,512], index: 1, kind: input, shape index: {}]   ;;  %s3072_s2 = inlined_call_operand.vmem [shape: f32[4,512], index: 2, kind: input, shape index: {}]   ;;  %s3073_s3 = inlined_call_operand.vmem [shape: bf16[128,2], index: 3, kind: input, shape index: {}]   ;;  %s3074_s4 = inlined_call_operand.vmem [shape: bf16[128,4], index: 4, kind: input, shape index: {}]   ;;  %s3075_s5 = inlined_call_operand.vmem [shape: f32[128,1], index: 5, kind: input, shape index: {}]   ;;  %s3076_s6 = inlined_call_operand.vmem [shape: bf16[128,128], index: 6, kind: input, shape index: {}]   ;;  %s3077_s7 = inlined_call_operand.vmem [shape: f32[128,1], index: 7, kind: input, shape index: {}]   ;;  %s3078_s8 = inlined_call_operand.vmem [shape: bf16[2,128], index: 8, kind: input, shape index: {}]   ;;  %s3079_s9 = inlined_call_operand.vmem [shape: f32[2,1], index: 9, kind: input, shape index: {}]   ;;  %s3080_s10 = inlined_call_operand.hbm [shape: f32[4,512], index: 10, kind: output, shape index: {}]  }
   0x1   :  { %3081 = sst [smem:[#allocation8_spill]] %s3070_s0 }
   0x2   :  { %15 = vsyncpa [#allocation4], 0 }
   0x3   :  { %16 = vsyncpa [#allocation3], 0 }
   0x4   :  { %18 = vsyncpa [#allocation3 + $0x1], 0  ;;  %s2369_s13 = smov 0   ;;  %s2371_s14 = smov 0  }
   0x5   :  { %s2373_s15 = smov 0   ;;  %s2375_s16 = smov 0  }
   0x6 LB: > { %s2390_s17 = sadd.s32 4294967295, %s2307_s16   ;;  %s1860_s18 = sadd.s32 4294967294, %s2307_s16   ;;  %s2307_s16 = sphi %s2375_s16, %s3089_s16   ;;  %s2303_s15 = sphi %s2373_s15, %s3088_s15   ;;  %s2299_s14 = sphi %s2371_s14, %s3087_s14   ;;  %s2295_s13 = sphi %s2369_s13, %s3086_s13  }
   0x7   : > { %s2394_s19 = sadd.s32 1, %s2307_s16   ;;  %s251_s20 = sadd.s32 1, %s2303_s15 }
   0x8   : > { %s248_s21 = ssub.s32 %s2307_s16, %s2394_s19  ;;  %p261_p0 = scmp.ne.s32.totalorder %s2303_s15, %s2299_s14 }
   0x9   : > { %p249_p1 = scmp.eq.s32.totalorder %s248_s21, 0  ;;  %p262_p2 = scmp.eq.s32.totalorder %s2390_s17, 1 }
   0xa   : > { %p267_p3 = scmp.ne.s32.totalorder %s2299_s14, %s2295_s13  ;;  %p268_p4 = scmp.eq.s32.totalorder %s1860_s18, 1 }
   0xb   : > { %s2405_s22 = scalar_select %p249_p1, %s2303_s15, %s251_s20  }
   0xc   : > { %p2407_p5 = por %p262_p2, %p261_p0  ;;  %p2411_p6 = por %p268_p4, %p267_p3 }
   0xd   : > { %p1861_p7 = scmp.ge.s32.totalorder %s2307_s16, 1  ;;  %p275_p8 = scmp.lt.s32.totalorder %s2307_s16, 3 }
   0xe   : > { %p2032_p9 = scmp.eq.s32.totalorder %s2390_s17, 0  ;;  %s3085_s0 = sld [smem:[#allocation8_spill]] }
   0xf   : > { %p2418_p10 = pnand %p1861_p7, %p275_p8 }
  0x11   : > { %p2024_p11 = pneg %p2418_p10 }
  0x13   : > { %p2025_p12 = pnand %p2032_p9, %p2024_p11 }
  0x14   : > { %s288_s28 = sshll.u32 %s3085_s0, 4  ;;  %s289_s28 = int_to_ptr.vmem [resolvable:$true] %s288_s28 }
  0x15   : > { %s2226_s29 = scalar_lea.vmem %s289_s28, 16  ;;  %p2228_p0 = pneg %p2025_p12 }
  0x16   : > { %p2227_p13 = scmp.ne.s32.totalorder %s289_s28, %s2226_s29  ;;  %p2234_p3 = scmp.lt.s32.totalorder %s289_s28, %s289_s28 }
  0x17   : > { %p2235_p4 = scmp.lt.s32.totalorder %s2226_s29, %s2226_s29 }
  0x18   : > { %p2229_p1 = pnand %p2228_p0, %p2227_p13 }
  0x19   : > { %p2236_p7 = por %p2235_p4, %p2234_p3 }
  0x1a   : > { %p2230_p2 = pneg %p2229_p1 }
  0x1c   : > { %p2237_p8 = pnand %p2236_p7, %p2230_p2 }
  0x1e   : > { %2240 = shalt.err (!%p2237_p8)
}
  0x1f   : > { %s2309_s30 = smov [#allocation2]   ;;  %340 = sbr.rel (%p2418_p10) target bundleno = 948 (0x3b4), region = 60 }
  0x20   : > { %2027 = dma.vmem_to_smem (!%p2025_p12), %s289_s28, 16, %s2309_s30, [#allocation4]  }
  0x26   : > { %2286 = dma.done.wait (%p2032_p9), [#allocation4], 16  }
  0x27   : > { %2288 = vsyncadd (%p2032_p9), [#allocation4], 4294967280 }
  0x28   : > { %346 = sfence }
  0x29   : > { %s1867_s11 = sshll.u32 %s2390_s17, 1  ;;  %v404_v0 = vlaneseq  ;;  %s1978_s12 = sld [smem:[#allocation2 + $0x2]]  ;;  %v2310_v1 = vmov 1983009808   ;;  %v2311_v4 = vmov 0   ;;  %vm515_vm0 = vcmask 1041408  }
  0x2a   : > { %p385_p11 = scmp.lt.s32.totalorder %s1867_s11, 3  ;;  %v402_v2 = vunpack.c.l.s4 %v2310_v1  ;;  %554 = vmatprep.mubr.bf16.mxu0 %v2311_v4  ;;  %2071 = vset.pattern.permute.xlu0 %v2311_v4  ;;  %s2440_s18 = sld [smem:[#allocation2]]  ;;  %v2312_v6 = vmov 858984721   ;;  %vm490_vm1 = vcmask 31744   ;;  %vm700_vm2 = vcmask 1040384  }
  0x2b   : > { %v405_v3 = vshrl.u32 %v404_v0, 7  ;;  %2072 = vset.pattern.permute.xlu1 %v2311_v4  ;;  %1348 = vmatprep.mubr.bf16.mxu1 %v2311_v4  ;;  %s2442_s20 = sld [smem:[#allocation2 + $0x1]]  ;;  %v1689_v7 = vunpack.c.l.s4 %v2312_v6  ;;  %v2074_v23 = vld [vmem:[%s3074_s4] sm:$0xff]   ;;  %v2075_v46 = vld [vmem:[%s3074_s4 + $0x8] sm:$0xff]   ;;  %v822_v50 = vld [vmem:[%s3075_s5 + $0x10] sm:$0xff]  ;;  %vm675_vm3 = vcmask 15360  }
  0x2c   : > { %s3091_s11 = smov (!%p385_p11, %s1867_s11), 3  ;;  %v403_v5 = vunpack.c.0.s8 %v402_v2  ;;  %v820_v45 = vld [vmem:[%s3075_s5] sm:$0xff]  ;;  %v821_v49 = vld [vmem:[%s3075_s5 + $0x8] sm:$0xff]  ;;  %848 = vperm.xlu1 %2072, %v822_v50   ;;  %v823_v51 = vld [vmem:[%s3075_s5 + $0x18] sm:$0xff]  ;;  %s381_s27 = sand.u32 1, %s2299_s14  }
  0x2d   : > { %s1870_s21 = sshll.u32 %s3091_s11, 2  ;;  %s1868_s25 = sshll.u32 %s3091_s11, 1  ;;  %v1690_v10 = vunpack.c.0.s8 %v1689_v7  ;;  %v1728_v30 = vsub.s32 3, %v405_v3  ;;  %v1732_v31 = vsub.s32 7, %v405_v3  ;;  %v1739_v35 = vsub.s32 0, %v405_v3  ;;  %838 = vperm.xlu0 %2071, %v820_v45   ;;  %v824_v52 = vld [vmem:[%s3075_s5 + $0x20] sm:$0xff] }
  0x2e   : > { %v406_v8 = vsub.s32 %v403_v5, %v405_v3  ;;  %s394_s28 = scalar_lea.vmem %s3072_s2, %s1870_s21  ;;  %s388_s0 = scalar_lea.vmem %s3071_s1, %s1868_s25  ;;  %v1743_v37 = vsub.s32 2, %v405_v3  ;;  %v825_v53 = vld [vmem:[%s3075_s5 + $0x28] sm:$0xff]  ;;  %v2076_v54 = vld [vmem:[%s3074_s4 + $0x10] sm:$0xff]   ;;  %v827_v56 = vld [vmem:[%s3075_s5 + $0x38] sm:$0xff] }
  0x2f   : > { %v1711_v9 = vstv %s1978_s12  ;;  %v399_v11 = vld [vmem:[%s394_s28] sm:$0xff]  ;;  %v1693_v18 = vsub.s32 %v1690_v10, %v405_v3  ;;  %v826_v55 = vld [vmem:[%s3075_s5 + $0x30] sm:$0xff]  ;;  %v829_v58 = vld [vmem:[%s3075_s5 + $0x48] sm:$0xff]  ;;  %s1866_s28 = sshll.u32 %s381_s27, 3  ;;  %s1985_s29 = sshll.u32 %s2390_s17, 7 }
  0x30   : > { %v398_v12 = vld [vmem:[%s388_s0] sm:$0xf]  ;;  %v414_v13 = vcombine.high %v399_v11, %v399_v11  ;;  %v1705_v14 = vrot.slane %v399_v11, %v406_v8  ;;  %v1712_v15 = vmul.f32 %v1711_v9, %v399_v11  ;;  %v416_v16 = vpack.c.bf16 %v399_v11, %v399_v11  ;;  %853 = vperm.xlu1 %2072, %v823_v51   ;;  %v2077_v59 = vld [vmem:[%s3074_s4 + $0x18] sm:$0xff]   ;;  %v830_v60 = vld [vmem:[%s3075_s5 + $0x50] sm:$0xff]  ;;  %s383_s30 = scalar_lea.vmem [#allocation5], %s1866_s28  ;;  %s1763_s17 = scalar_lea.sflag [#allocation3], %s381_s27 }
  0x31   : > { %v407_v17 = vrot.slane %v398_v12, %v406_v8  ;;  %v1709_v22 = vstv %s2442_s20  ;;  %v1694_v25 = vrot.slane %v398_v12, %v1693_v18  ;;  %v1697_v28 = vstv %s2440_s18  ;;  %843 = vperm.xlu0 %2071, %v821_v49   ;;  %v828_v57 = vld [vmem:[%s3075_s5 + $0x40] sm:$0xff]  ;;  %v831_v61 = vld [vmem:[%s3075_s5 + $0x58] sm:$0xff]  ;;  %s1777_s11 = sshll.u32 %s383_s30, 4  ;;  %s3028_s18 = scalar_lea.hbm %s3080_s10, %s1985_s29  ;;  %s3030_s11 = int_to_ptr.vmem [resolvable:$true] %s1777_s11 }
  0x32   : > { %v417_v19 = vpack.c.bf16 %v414_v13, %v414_v13  ;;  %v1706_v20 = vcombine.high %v1705_v14, %v1705_v14  ;;  %v517_v21 = vsel %vm515_vm0, %v416_v16, 0  ;;  %v1720_v26 = vrot.slane %v1712_v15, %v406_v8  ;;  %v832_v62 = vld [vmem:[%s3075_s5 + $0x60] sm:$0xff]  ;;  %v833_v63 = vld [vmem:[%s3075_s5 + $0x68] sm:$0xff]  ;;  %v834_v1 = vld [vmem:[%s3075_s5 + $0x70] sm:$0xff]  ;;  %s2241_s20 = scalar_lea.vmem %s3030_s11, 128  ;;  %s2313_s21 = smov [#allocation5]  }
  0x33   : > { %v408_v24 = vcombine.high %v407_v17, %v407_v17  ;;  %v411_v27 = vpack.c.bf16 %v407_v17, %v407_v17  ;;  %v1696_v33 = vsub.f32 %v399_v11, %v1694_v25  ;;  %v2078_v0 = vld [vmem:[%s3074_s4 + $0x20] sm:$0xff]   ;;  %v835_v2 = vld [vmem:[%s3075_s5 + $0x78] sm:$0xff]  ;;  %v1173_v5 = vld [vmem:[%s3077_s7 + $0x8] sm:$0xff]  ;;  %p2242_p9 = scmp.ne.s32.totalorder %s3030_s11, %s2241_s20  ;;  %s2245_s25 = sshll.u32 %s2313_s21, 4  ;;  %s2246_s25 = int_to_ptr.vmem [resolvable:$false] %s2245_s25 }
  0x34   : > { %1879 = vmatprep.subr.msk.bf16.mxu0 %vm515_vm0, %v417_v19  ;;  %v1708_v29 = vsub.f32 %v398_v12, %v1706_v20  ;;  %v1979_v34 = vrot.slane %v1720_v26, 9  ;;  %863 = vperm.xlu1 %2072, %v825_v53   ;;  %v1172_v3 = vld [vmem:[%s3077_s7] sm:$0xff]  ;;  %v2079_v6 = vld [vmem:[%s3074_s4 + $0x28] sm:$0xff]   ;;  %v1174_v7 = vld [vmem:[%s3077_s7 + $0x10] sm:$0xff]  ;;  %s2247_s26 = scalar_lea.vmem %s2246_s25, 256  ;;  %p2248_p13 = scmp.lt.s32.totalorder %s3030_s11, %s2246_s25 }
  0x35   : > { %523 = vmatpush1.bf16.msra.mxu0 %v517_v21  ;;  %v412_v32 = vpack.c.bf16 %v408_v24, %v408_v24  ;;  %v702_v38 = vsel %vm700_vm2, %v411_v27, 0  ;;  %v1698_v39 = vmul.f32 %v1697_v28, %v1696_v33  ;;  %858 = vperm.xlu0 %2071, %v824_v52   ;;  %v1175_v8 = vld [vmem:[%s3077_s7 + $0x18] sm:$0xff]  ;;  %v1176_v9 = vld [vmem:[%s3077_s7 + $0x20] sm:$0xff]  ;;  %v1177_v10 = vld [vmem:[%s3077_s7 + $0x28] sm:$0xff]  ;;  %p2243_p10 = pnand %p2242_p9, %p2407_p5  ;;  %p2249_p0 = scmp.lt.s32.totalorder %s2247_s26, %s2241_s20 }
  0x36   : > { %v1710_v36 = vmul.f32 %v1709_v22, %v1708_v29  ;;  %v2080_v11 = vld [vmem:[%s3074_s4 + $0x30] sm:$0xff]   ;;  %v1179_v13 = vld [vmem:[%s3077_s7 + $0x38] sm:$0xff]  ;;  %v1180_v14 = vld [vmem:[%s3077_s7 + $0x40] sm:$0xff] }
  0x37   : > { %1896 = vmatprep.subr.msk.bf16.mxu0 %vm700_vm2, %v412_v32  ;;  %v1729_v41 = vrot.slane %v1698_v39, %v1728_v30  ;;  %v1733_v42 = vrot.slane %v1698_v39, %v1732_v31  ;;  %v1178_v12 = vld [vmem:[%s3077_s7 + $0x30] sm:$0xff]  ;;  %v1181_v15 = vld [vmem:[%s3077_s7 + $0x48] sm:$0xff]  ;;  %v2081_v16 = vld [vmem:[%s3074_s4 + $0x38] sm:$0xff]   ;;  %p2244_p12 = pneg %p2243_p10  ;;  %p2250_p1 = por %p2249_p0, %p2248_p13 }
  0x38   : > { %1880 = vmatmul.mubr.msk.bf16.vlgmr.msra.gmra.mrb[0].mxu0 %vm490_vm1, %v2074_v23  ;;  %v1724_v40 = vsub.f32 %v1710_v36, %v1979_v34  ;;  %873 = vperm.xlu1 %2072, %v827_v56   ;;  %v1182_v17 = vld [vmem:[%s3077_s7 + $0x50] sm:$0xff]  ;;  %v1183_v18 = vld [vmem:[%s3077_s7 + $0x58] sm:$0xff]  ;;  %v1184_v19 = vld [vmem:[%s3077_s7 + $0x60] sm:$0xff] }
  0x39   : > { %708 = vmatpush1.bf16.msra.mxu0 %v702_v38  ;;  %564 = vmatprep.mubr.bf16.mxu0 %v2311_v4  ;;  %v1185_v20 = vld [vmem:[%s3077_s7 + $0x68] sm:$0xff]  ;;  %v2082_v21 = vld [vmem:[%s3073_s3] sm:$0xff]   ;;  %v1186_v22 = vld [vmem:[%s3077_s7 + $0x70] sm:$0xff]  ;;  %p2251_p2 = pnand %p2250_p1, %p2244_p12 }
  0x3a   : > { %v1740_v43 = vrot.slane %v1724_v40, %v1739_v35  ;;  %v1744_v44 = vrot.slane %v1724_v40, %v1743_v37  ;;  %868 = vperm.xlu0 %2071, %v826_v55   ;;  %v1187_v23 = vld [vmem:[%s3077_s7 + $0x78] sm:$0xff]  ;;  %v1638_v24 = vld [vmem:[%s3079_s9] sm:$0x3]  ;;  %v2083_v25 = vld [vmem:[%s3073_s3 + $0x8] sm:$0xff]  }
  0x3b   : > { %v2084_v26 = vld [vmem:[%s3073_s3 + $0x10] sm:$0xff]   ;;  %v2085_v27 = vld [vmem:[%s3073_s3 + $0x18] sm:$0xff]   ;;  %v2086_v28 = vld [vmem:[%s3073_s3 + $0x20] sm:$0xff]  }
  0x3c   : > { %v2468_v47 = vsel %vm700_vm2, %v1729_v41, %v1740_v43  ;;  %v2471_v48 = vsel %vm700_vm2, %v1733_v42, %v1744_v44  ;;  %883 = vperm.xlu1 %2072, %v829_v58   ;;  %v2087_v29 = vld [vmem:[%s3073_s3 + $0x28] sm:$0xff]   ;;  %v2088_v30 = vld [vmem:[%s3073_s3 + $0x30] sm:$0xff]   ;;  %v2089_v31 = vld [vmem:[%s3073_s3 + $0x38] sm:$0xff]  }
  0x3e   : > { %878 = vperm.xlu0 %2071, %v828_v57  }
  0x40   : > { %1881 = vmatmul.mubr.msk.bf16.gmra.mrb[4].mxu0 %vm490_vm1, %v2075_v46  ;;  %893 = vperm.xlu1 %2072, %v831_v61  }
  0x41   : > { %574 = vmatprep.mubr.bf16.mxu0 %v2311_v4 }
  0x42   : > { %888 = vperm.xlu0 %2071, %v830_v60  }
  0x44   : > { %903 = vperm.xlu1 %2072, %v833_v63  }
  0x46   : > { %898 = vperm.xlu0 %2071, %v832_v62  }
  0x48   : > { %1882 = vmatmul.mubr.msk.bf16.gmra.mrb[8].mxu0 %vm490_vm1, %v2076_v54  ;;  %913 = vperm.xlu1 %2072, %v835_v2  }
  0x49   : > { %584 = vmatprep.mubr.bf16.mxu0 %v2311_v4 }
  0x4a   : > { %908 = vperm.xlu0 %2071, %v834_v1  }
  0x4c   : > { %1195 = vperm.xlu1 %2072, %v1173_v5  }
  0x4e   : > { %1190 = vperm.xlu0 %2071, %v1172_v3  }
  0x50   : > { %1883 = vmatmul.mubr.msk.bf16.gmra.mrb[12].mxu0 %vm490_vm1, %v2077_v59  ;;  %1205 = vperm.xlu1 %2072, %v1175_v8  }
  0x51   : > { %594 = vmatprep.mubr.bf16.mxu0 %v2311_v4 }
  0x52   : > { %1200 = vperm.xlu0 %2071, %v1174_v7  }
  0x54   : > { %1215 = vperm.xlu1 %2072, %v1177_v10  }
  0x56   : > { %1210 = vperm.xlu0 %2071, %v1176_v9  }
  0x58   : > { %1884 = vmatmul.mubr.msk.bf16.gmra.mrb[16].mxu0 %vm490_vm1, %v2078_v0  ;;  %1225 = vperm.xlu1 %2072, %v1179_v13  }
  0x59   : > { %604 = vmatprep.mubr.bf16.mxu0 %v2311_v4 }
  0x5a   : > { %1220 = vperm.xlu0 %2071, %v1178_v12  }
  0x5c   : > { %1235 = vperm.xlu1 %2072, %v1181_v15  }
  0x5e   : > { %1230 = vperm.xlu0 %2071, %v1180_v14  }
  0x60   : > { %1885 = vmatmul.mubr.msk.bf16.gmra.mrb[20].mxu0 %vm490_vm1, %v2079_v6  ;;  %1245 = vperm.xlu1 %2072, %v1183_v18  }
  0x61   : > { %614 = vmatprep.mubr.bf16.mxu0 %v2311_v4 }
  0x62   : > { %1240 = vperm.xlu0 %2071, %v1182_v17  }
  0x64   : > { %1255 = vperm.xlu1 %2072, %v1185_v20  }
  0x66   : > { %1250 = vperm.xlu0 %2071, %v1184_v19  }
  0x68   : > { %1886 = vmatmul.mubr.msk.bf16.gmra.mrb[24].mxu0 %vm490_vm1, %v2080_v11  ;;  %1265 = vperm.xlu1 %2072, %v1187_v23  }
  0x69   : > { %624 = vmatprep.mubr.bf16.mxu0 %v2311_v4 }
  0x6a   : > { %1260 = vperm.xlu0 %2071, %v1186_v22  }
  0x6e   : > { %1641 = vperm.xlu0 %2071, %v1638_v24  }
  0x70   : > { %1887 = vmatmul.mubr.msk.bf16.gmra.mrb[28].mxu0 %vm490_vm1, %v2081_v16 }
  0x71   : > { %739 = vmatprep.mubr.bf16.mxu0 %v2311_v4 }
  0x78   : > { %1897 = vmatmul.mubr.msk.bf16.vlgmr.msra.gmra.mrb[0].mxu0 %vm675_vm3, %v2082_v21 }
  0x79   : > { %749 = vmatprep.mubr.bf16.mxu0 %v2311_v4 }
  0x80   : > { %1898 = vmatmul.mubr.msk.bf16.gmra.mrb[4].mxu0 %vm675_vm3, %v2083_v25 }
  0x81   : > { %759 = vmatprep.mubr.bf16.mxu0 %v2311_v4 }
  0x88   : > { %1899 = vmatmul.mubr.msk.bf16.gmra.mrb[8].mxu0 %vm675_vm3, %v2084_v26 }
  0x89   : > { %769 = vmatprep.mubr.bf16.mxu0 %v2311_v4 }
  0x90   : > { %1900 = vmatmul.mubr.msk.bf16.gmra.mrb[12].mxu0 %vm675_vm3, %v2085_v27 }
  0x91   : > { %779 = vmatprep.mubr.bf16.mxu0 %v2311_v4 }
  0x98   : > { %1901 = vmatmul.mubr.msk.bf16.gmra.mrb[16].mxu0 %vm675_vm3, %v2086_v28 }
  0x99   : > { %789 = vmatprep.mubr.bf16.mxu0 %v2311_v4 }
  0xa0   : > { %1902 = vmatmul.mubr.msk.bf16.gmra.mrb[20].mxu0 %vm675_vm3, %v2087_v29 }
  0xa1   : > { %799 = vmatprep.mubr.bf16.mxu0 %v2311_v4 }
  0xa8   : > { %1903 = vmatmul.mubr.msk.bf16.gmra.mrb[24].mxu0 %vm675_vm3, %v2088_v30 }
  0xa9   : > { %809 = vmatprep.mubr.bf16.mxu0 %v2311_v4 }
  0xab   : > { %v849_v42 = vpop.permute.xlu1 %848 }
  0xac   : > { %v839_v32 = vpop.permute.xlu0 %838 }
  0xaf   : > { %v854_v56 = vpop.permute.xlu1 %853 }
  0xb0   : > { %1904 = vmatmul.mubr.msk.bf16.gmra.mrb[28].mxu0 %vm675_vm3, %v2089_v31  ;;  %v844_v36 = vpop.permute.xlu0 %843 }
  0xb3   : > { %v864_v13 = vpop.permute.xlu1 %863 }
  0xb4   : > { %v859_v6 = vpop.permute.xlu0 %858 }
 0x14b   : > { %v741_v33 = vpop.f32.mrb[0].mxu0 }
 0x14c   : > { %v2640_v34 = vadd.f32 %v839_v32, %v741_v33  ;;  %v743_v35 = vpop.f32.mrb[1].mxu0 }
 0x14d   : > { %v2642_v37 = vadd.f32 %v839_v32, %v743_v35  ;;  %v745_v38 = vpop.f32.mrb[2].mxu0 }
 0x14e   : > { %v980_v39 = vmin.f32 %v2640_v34, 0.0  ;;  %v2645_v40 = vadd.f32 %v844_v36, %v745_v38  ;;  %v747_v41 = vpop.f32.mrb[3].mxu0  ;;  %vm948_vm4 = vcmp.gt.f32.partialorder %v2640_v34, 0.0 }
 0x14f   : > { %v981_v43 = vmin.f32 %v2642_v37, 0.0  ;;  %v2648_v44 = vadd.f32 %v844_v36, %v747_v41  ;;  %vm949_vm5 = vcmp.gt.f32.partialorder %v2642_v37, 0.0  ;;  %v869_v36 = vpop.permute.xlu0 %868 }
 0x150   : > { %v1012_v45 = vmul.f32 1.442695, %v980_v39  ;;  %v982_v46 = vmin.f32 %v2645_v40, 0.0  ;;  %vm950_vm6 = vcmp.gt.f32.partialorder %v2645_v40, 0.0 }
 0x151   : > { %v1014_v49 = vmul.f32 1.442695, %v981_v43  ;;  %v983_v50 = vmin.f32 %v2648_v44, 0.0  ;;  %vm951_vm7 = vcmp.gt.f32.partialorder %v2648_v44, 0.0 }
 0x152   : > { %2098 = vpow2.f32 %v1012_v45  ;;  %v1016_v51 = vmul.f32 1.442695, %v982_v46 }
 0x153   : > { %2100 = vpow2.f32 %v1014_v49  ;;  %v1018_v52 = vmul.f32 1.442695, %v983_v50  ;;  %v751_v53 = vpop.f32.mrb[4].mxu0  ;;  %v874_v50 = vpop.permute.xlu1 %873 }
 0x154   : > { %2102 = vpow2.f32 %v1016_v51  ;;  %v2652_v54 = vadd.f32 %v849_v42, %v751_v53  ;;  %v753_v55 = vpop.f32.mrb[5].mxu0 }
 0x155   : > { %2104 = vpow2.f32 %v1018_v52  ;;  %v2654_v57 = vadd.f32 %v849_v42, %v753_v55  ;;  %v755_v58 = vpop.f32.mrb[6].mxu0 }
 0x156   : > { %v984_v59 = vmin.f32 %v2652_v54, 0.0  ;;  %v2657_v60 = vadd.f32 %v854_v56, %v755_v58  ;;  %v757_v61 = vpop.f32.mrb[7].mxu0  ;;  %vm952_vm8 = vcmp.gt.f32.partialorder %v2652_v54, 0.0 }
 0x157   : > { %v985_v62 = vmin.f32 %v2654_v57, 0.0  ;;  %v2660_v63 = vadd.f32 %v854_v56, %v757_v61  ;;  %vm953_vm9 = vcmp.gt.f32.partialorder %v2654_v57, 0.0 }
 0x158   : > { %v1020_v0 = vmul.f32 1.442695, %v984_v59  ;;  %v986_v1 = vmin.f32 %v2657_v60, 0.0  ;;  %vm954_vm10 = vcmp.gt.f32.partialorder %v2657_v60, 0.0 }
 0x159   : > { %v1022_v2 = vmul.f32 1.442695, %v985_v62  ;;  %v987_v3 = vmin.f32 %v2660_v63, 0.0  ;;  %vm955_vm11 = vcmp.gt.f32.partialorder %v2660_v63, 0.0 }
 0x15a   : > { %2106 = vpow2.f32 %v1020_v0  ;;  %v1024_v5 = vmul.f32 1.442695, %v986_v1 }
 0x15b   : > { %2108 = vpow2.f32 %v1022_v2  ;;  %v1026_v7 = vmul.f32 1.442695, %v987_v3  ;;  %v761_v8 = vpop.f32.mrb[8].mxu0 }
 0x15c   : > { %v2099_v9 = vpop.eup %2098  ;;  %2110 = vpow2.f32 %v1024_v5  ;;  %v2664_v10 = vadd.f32 %v859_v6, %v761_v8  ;;  %v763_v11 = vpop.f32.mrb[9].mxu0 }
 0x15d   : > { %v2101_v12 = vpop.eup %2100  ;;  %2112 = vpow2.f32 %v1026_v7  ;;  %v2666_v14 = vadd.f32 %v859_v6, %v763_v11  ;;  %v765_v15 = vpop.f32.mrb[10].mxu0  ;;  %v1905_v21 = vadd.f32 -1.0, %v2099_v9 }
 0x15e   : > { %v2103_v16 = vpop.eup %2102  ;;  %v988_v17 = vmin.f32 %v2664_v10, 0.0  ;;  %v2670_v18 = vadd.f32 %v864_v13, %v765_v15  ;;  %v767_v19 = vpop.f32.mrb[11].mxu0  ;;  %v1906_v20 = vadd.f32 -1.0, %v2101_v12  ;;  %vm956_vm12 = vcmp.gt.f32.partialorder %v2664_v10, 0.0 }
 0x15f   : > { %v2105_v22 = vpop.eup %2104  ;;  %v989_v23 = vmin.f32 %v2666_v14, 0.0  ;;  %v2673_v24 = vadd.f32 %v864_v13, %v767_v19  ;;  %v1907_v25 = vadd.f32 -1.0, %v2103_v16  ;;  %v1108_v35 = vsel %vm948_vm4, %v2640_v34, %v1905_v21  ;;  %v879_v11 = vpop.permute.xlu0 %878 }
 0x160   : > { %v1028_v26 = vmul.f32 1.442695, %v988_v17  ;;  %v990_v27 = vmin.f32 %v2670_v18, 0.0  ;;  %v1908_v28 = vadd.f32 -1.0, %v2105_v22  ;;  %v1109_v31 = vsel %vm949_vm5, %v2642_v37, %v1906_v20  ;;  %v884_v21 = vpop.permute.xlu1 %883 }
 0x161   : > { %v1030_v29 = vmul.f32 1.442695, %v989_v23  ;;  %v991_v30 = vmin.f32 %v2673_v24, 0.0  ;;  %v1110_v42 = vsel %vm950_vm6, %v2645_v40, %v1907_v25  ;;  %vm957_vm13 = vcmp.gt.f32.partialorder %v2666_v14, 0.0 }
 0x162   : > { %2114 = vpow2.f32 %v1028_v26  ;;  %v1032_v32 = vmul.f32 1.442695, %v990_v27  ;;  %v1111_v33 = vsel %vm951_vm7, %v2648_v44, %v1908_v28  ;;  %v1156_v46 = vpack.c.bf16 %v1110_v42, %v1108_v35 }
 0x163   : > { %2116 = vpow2.f32 %v1030_v29  ;;  %v1034_v38 = vmul.f32 1.442695, %v991_v30  ;;  %v771_v39 = vpop.f32.mrb[12].mxu0  ;;  %v1157_v41 = vpack.c.bf16 %v1111_v33, %v1109_v31  ;;  %vm958_vm14 = vcmp.gt.f32.partialorder %v2670_v18, 0.0 }
 0x164   : > { %v2107_v43 = vpop.eup %2106  ;;  %2118 = vpow2.f32 %v1032_v32  ;;  %v2686_v45 = vadd.f32 %v869_v36, %v771_v39  ;;  %v773_v37 = vpop.f32.mrb[13].mxu0  ;;  %vm959_vm15 = vcmp.gt.f32.partialorder %v2673_v24, 0.0 }
 0x165   : > { %v2109_v49 = vpop.eup %2108  ;;  %2120 = vpow2.f32 %v1034_v38  ;;  %v2689_v44 = vadd.f32 %v869_v36, %v773_v37  ;;  %v775_v34 = vpop.f32.mrb[14].mxu0  ;;  %1316 = vmatprep.subr.bf16.mxu1 %v1157_v41  ;;  %v1909_v52 = vadd.f32 -1.0, %v2107_v43 }
 0x166   : > { %v2111_v51 = vpop.eup %2110  ;;  %v1910_v53 = vadd.f32 -1.0, %v2109_v49  ;;  %v992_v40 = vmin.f32 %v2686_v45, 0.0  ;;  %v2692_v55 = vadd.f32 %v874_v50, %v775_v34  ;;  %v777_v56 = vpop.f32.mrb[15].mxu0  ;;  %1317 = vmatpush1.bf16.msra.mxu1 %v1156_v46  ;;  %vm960_vm1 = vcmp.gt.f32.partialorder %v2686_v45, 0.0 }
 0x167   : > { %v2113_v58 = vpop.eup %2112  ;;  %v1911_v59 = vadd.f32 -1.0, %v2111_v51  ;;  %v993_v61 = vmin.f32 %v2689_v44, 0.0  ;;  %v2696_v62 = vadd.f32 %v874_v50, %v777_v56  ;;  %v1112_v9 = vsel %vm952_vm8, %v2652_v54, %v1909_v52  ;;  %v889_v46 = vpop.permute.xlu0 %888 }
 0x168   : > { %v1912_v0 = vadd.f32 -1.0, %v2113_v58  ;;  %v1036_v1 = vmul.f32 1.442695, %v992_v40  ;;  %v994_v2 = vmin.f32 %v2692_v55, 0.0  ;;  %v1113_v6 = vsel %vm953_vm9, %v2654_v57, %v1910_v53  ;;  %v894_v56 = vpop.permute.xlu1 %893 }
 0x169   : > { %v1038_v3 = vmul.f32 1.442695, %v993_v61  ;;  %v995_v5 = vmin.f32 %v2696_v62, 0.0  ;;  %v1114_v16 = vsel %vm954_vm10, %v2657_v60, %v1911_v59  ;;  %vm961_vm2 = vcmp.gt.f32.partialorder %v2689_v44, 0.0 }
 0x16a   : > { %2122 = vpow2.f32 %v1036_v1  ;;  %v1040_v7 = vmul.f32 1.442695, %v994_v2  ;;  %v1115_v8 = vsel %vm955_vm11, %v2660_v63, %v1912_v0  ;;  %v1158_v20 = vpack.c.bf16 %v1114_v16, %v1112_v9 }
 0x16b   : > { %2124 = vpow2.f32 %v1038_v3  ;;  %v1042_v12 = vmul.f32 1.442695, %v995_v5  ;;  %v781_v13 = vpop.f32.mrb[16].mxu0  ;;  %v1159_v15 = vpack.c.bf16 %v1115_v8, %v1113_v6  ;;  %vm962_vm3 = vcmp.gt.f32.partialorder %v2692_v55, 0.0 }
 0x16c   : > { %v2115_v17 = vpop.eup %2114  ;;  %2126 = vpow2.f32 %v1040_v7  ;;  %v2710_v57 = vadd.f32 %v879_v11, %v781_v13  ;;  %v783_v19 = vpop.f32.mrb[17].mxu0  ;;  %vm963_vm4 = vcmp.gt.f32.partialorder %v2696_v62, 0.0 }
 0x16d   : > { %v2117_v63 = vpop.eup %2116  ;;  %2128 = vpow2.f32 %v1042_v12  ;;  %v2713_v54 = vadd.f32 %v879_v11, %v783_v19  ;;  %v785_v22 = vpop.f32.mrb[18].mxu0  ;;  %1318 = vmatprep.subr.bf16.mxu1 %v1159_v15  ;;  %v1913_v25 = vadd.f32 -1.0, %v2115_v17 }
 0x16e   : > { %v2119_v23 = vpop.eup %2118  ;;  %v1914_v26 = vadd.f32 -1.0, %v2117_v63  ;;  %v996_v60 = vmin.f32 %v2710_v57, 0.0  ;;  %v2716_v27 = vadd.f32 %v884_v21, %v785_v22  ;;  %v787_v28 = vpop.f32.mrb[19].mxu0  ;;  %1319 = vmatpush1.bf16.msra.mxu1 %v1158_v20  ;;  %vm964_vm5 = vcmp.gt.f32.partialorder %v2710_v57, 0.0 }
 0x16f   : > { %v2121_v29 = vpop.eup %2120  ;;  %v1915_v30 = vadd.f32 -1.0, %v2119_v23  ;;  %v997_v31 = vmin.f32 %v2713_v54, 0.0  ;;  %v2720_v32 = vadd.f32 %v884_v21, %v787_v28  ;;  %v1116_v37 = vsel %vm956_vm12, %v2664_v10, %v1913_v25  ;;  %v899_v20 = vpop.permute.xlu0 %898 }
 0x170   : > { %v1916_v33 = vadd.f32 -1.0, %v2121_v29  ;;  %v1044_v35 = vmul.f32 1.442695, %v996_v60  ;;  %v998_v36 = vmin.f32 %v2716_v27, 0.0  ;;  %v1117_v41 = vsel %vm957_vm13, %v2666_v14, %v1914_v26  ;;  %v904_v28 = vpop.permute.xlu1 %903 }
 0x171   : > { %v1046_v38 = vmul.f32 1.442695, %v997_v31  ;;  %v999_v39 = vmin.f32 %v2720_v32, 0.0  ;;  %v1118_v51 = vsel %vm958_vm14, %v2670_v18, %v1915_v30  ;;  %vm965_vm6 = vcmp.gt.f32.partialorder %v2713_v54, 0.0 }
 0x172   : > { %2130 = vpow2.f32 %v1044_v35  ;;  %v1048_v42 = vmul.f32 1.442695, %v998_v36  ;;  %v1119_v43 = vsel %vm959_vm15, %v2673_v24, %v1916_v33  ;;  %v1160_v40 = vpack.c.bf16 %v1118_v51, %v1116_v37 }
 0x173   : > { %2132 = vpow2.f32 %v1046_v38  ;;  %v1050_v49 = vmul.f32 1.442695, %v999_v39  ;;  %v791_v50 = vpop.f32.mrb[20].mxu0  ;;  %v1161_v34 = vpack.c.bf16 %v1119_v43, %v1117_v41  ;;  %vm966_vm7 = vcmp.gt.f32.partialorder %v2716_v27, 0.0 }
 0x174   : > { %v2123_v52 = vpop.eup %2122  ;;  %2134 = vpow2.f32 %v1048_v42  ;;  %v2734_v14 = vadd.f32 %v889_v46, %v791_v50  ;;  %v793_v53 = vpop.f32.mrb[21].mxu0  ;;  %vm967_vm8 = vcmp.gt.f32.partialorder %v2720_v32, 0.0 }
 0x175   : > { %v2125_v24 = vpop.eup %2124  ;;  %2136 = vpow2.f32 %v1050_v49  ;;  %v2737_v10 = vadd.f32 %v889_v46, %v793_v53  ;;  %v795_v58 = vpop.f32.mrb[22].mxu0  ;;  %1320 = vmatprep.subr.bf16.mxu1 %v1161_v34  ;;  %v1917_v61 = vadd.f32 -1.0, %v2123_v52 }
 0x176   : > { %v2127_v59 = vpop.eup %2126  ;;  %v1918_v0 = vadd.f32 -1.0, %v2125_v24  ;;  %v1000_v18 = vmin.f32 %v2734_v14, 0.0  ;;  %v2740_v1 = vadd.f32 %v894_v56, %v795_v58  ;;  %v797_v2 = vpop.f32.mrb[23].mxu0  ;;  %1321 = vmatpush1.bf16.msra.mxu1 %v1160_v40  ;;  %vm968_vm9 = vcmp.gt.f32.partialorder %v2734_v14, 0.0 }
 0x177   : > { %v2129_v3 = vpop.eup %2128  ;;  %v1919_v5 = vadd.f32 -1.0, %v2127_v59  ;;  %v1001_v6 = vmin.f32 %v2737_v10, 0.0  ;;  %v2744_v7 = vadd.f32 %v894_v56, %v797_v2  ;;  %v1120_v19 = vsel %vm960_vm1, %v2686_v45, %v1917_v61  ;;  %v909_v40 = vpop.permute.xlu0 %908 }
 0x178   : > { %v1920_v8 = vadd.f32 -1.0, %v2129_v3  ;;  %v1052_v9 = vmul.f32 1.442695, %v1000_v18  ;;  %v1002_v11 = vmin.f32 %v2740_v1, 0.0  ;;  %v1121_v15 = vsel %vm961_vm2, %v2689_v44, %v1918_v0  ;;  %v914_v2 = vpop.permute.xlu1 %913 }
 0x179   : > { %v1054_v12 = vmul.f32 1.442695, %v1001_v6  ;;  %v1003_v13 = vmin.f32 %v2744_v7, 0.0  ;;  %v1122_v23 = vsel %vm962_vm3, %v2692_v55, %v1919_v5  ;;  %vm969_vm10 = vcmp.gt.f32.partialorder %v2737_v10, 0.0 }
 0x17a   : > { %2138 = vpow2.f32 %v1052_v9  ;;  %v1056_v16 = vmul.f32 1.442695, %v1002_v11  ;;  %v1123_v17 = vsel %vm963_vm4, %v2696_v62, %v1920_v8  ;;  %v1162_v60 = vpack.c.bf16 %v1122_v23, %v1120_v19 }
 0x17b   : > { %2140 = vpow2.f32 %v1054_v12  ;;  %v1058_v63 = vmul.f32 1.442695, %v1003_v13  ;;  %v801_v21 = vpop.f32.mrb[24].mxu0  ;;  %v1163_v22 = vpack.c.bf16 %v1123_v17, %v1121_v15  ;;  %vm970_vm11 = vcmp.gt.f32.partialorder %v2740_v1, 0.0 }
 0x17c   : > { %v2131_v25 = vpop.eup %2130  ;;  %2142 = vpow2.f32 %v1056_v16  ;;  %v2758_v44 = vadd.f32 %v899_v20, %v801_v21  ;;  %v803_v26 = vpop.f32.mrb[25].mxu0  ;;  %vm971_vm12 = vcmp.gt.f32.partialorder %v2744_v7, 0.0 }
 0x17d   : > { %v2133_v62 = vpop.eup %2132  ;;  %2144 = vpow2.f32 %v1058_v63  ;;  %v2761_v45 = vadd.f32 %v899_v20, %v803_v26  ;;  %v805_v29 = vpop.f32.mrb[26].mxu0  ;;  %1322 = vmatprep.subr.bf16.mxu1 %v1163_v22  ;;  %v1921_v31 = vadd.f32 -1.0, %v2131_v25 }
 0x17e   : > { %v2135_v30 = vpop.eup %2134  ;;  %v1922_v33 = vadd.f32 -1.0, %v2133_v62  ;;  %v1004_v55 = vmin.f32 %v2758_v44, 0.0  ;;  %v2764_v35 = vadd.f32 %v904_v28, %v805_v29  ;;  %v807_v36 = vpop.f32.mrb[27].mxu0  ;;  %1323 = vmatpush1.bf16.msra.mxu1 %v1162_v60  ;;  %vm972_vm13 = vcmp.gt.f32.partialorder %v2758_v44, 0.0 }
 0x17f   : > { %v2137_v38 = vpop.eup %2136  ;;  %v1923_v39 = vadd.f32 -1.0, %v2135_v30  ;;  %v1005_v41 = vmin.f32 %v2761_v45, 0.0  ;;  %v2768_v42 = vadd.f32 %v904_v28, %v807_v36  ;;  %v1124_v53 = vsel %vm964_vm5, %v2710_v57, %v1921_v31 }
 0x180   : > { %v1924_v43 = vadd.f32 -1.0, %v2137_v38  ;;  %v1060_v37 = vmul.f32 1.442695, %v1004_v55  ;;  %v1006_v46 = vmin.f32 %v2764_v35, 0.0  ;;  %v1125_v34 = vsel %vm965_vm6, %v2713_v54, %v1922_v33 }
 0x181   : > { %v1062_v49 = vmul.f32 1.442695, %v1005_v41  ;;  %v1007_v50 = vmin.f32 %v2768_v42, 0.0  ;;  %v1126_v59 = vsel %vm966_vm7, %v2716_v27, %v1923_v39  ;;  %vm974_vm14 = vcmp.gt.f32.partialorder %v2764_v35, 0.0 }
 0x182   : > { %2146 = vpow2.f32 %v1060_v37  ;;  %v1064_v51 = vmul.f32 1.442695, %v1006_v46  ;;  %v1127_v52 = vsel %vm967_vm8, %v2720_v32, %v1924_v43  ;;  %v1164_v18 = vpack.c.bf16 %v1126_v59, %v1124_v53  ;;  %v2091_v59 = vld [vmem:[%s3076_s6 + $0x8] sm:$0xff]  }
 0x183   : > { %2148 = vpow2.f32 %v1062_v49  ;;  %v1066_v24 = vmul.f32 1.442695, %v1007_v50  ;;  %v811_v56 = vpop.f32.mrb[28].mxu0  ;;  %v1165_v58 = vpack.c.bf16 %v1127_v52, %v1125_v34  ;;  %vm973_vm15 = vcmp.gt.f32.partialorder %v2761_v45, 0.0 }
 0x184   : > { %v2139_v61 = vpop.eup %2138  ;;  %2150 = vpow2.f32 %v1064_v51  ;;  %v2782_v54 = vadd.f32 %v909_v40, %v811_v56  ;;  %v813_v0 = vpop.f32.mrb[29].mxu0  ;;  %vm975_vm1 = vcmp.gt.f32.partialorder %v2768_v42, 0.0 }
 0x185   : > { %v2141_v32 = vpop.eup %2140  ;;  %2152 = vpow2.f32 %v1066_v24  ;;  %v2785_v57 = vadd.f32 %v909_v40, %v813_v0  ;;  %v815_v3 = vpop.f32.mrb[30].mxu0  ;;  %1324 = vmatprep.subr.bf16.mxu1 %v1165_v58  ;;  %v1925_v6 = vadd.f32 -1.0, %v2139_v61  ;;  %v2090_v58 = vld [vmem:[%s3076_s6] sm:$0xff]   ;;  %v2092_v61 = vld [vmem:[%s3076_s6 + $0x10] sm:$0xff]  }
 0x186   : > { %v2143_v5 = vpop.eup %2142  ;;  %v1926_v8 = vadd.f32 -1.0, %v2141_v32  ;;  %v1008_v27 = vmin.f32 %v2782_v54, 0.0  ;;  %v2788_v9 = vadd.f32 %v914_v2, %v815_v3  ;;  %v817_v11 = vpop.f32.mrb[31].mxu0  ;;  %1325 = vmatpush1.bf16.msra.mxu1 %v1164_v18  ;;  %vm976_vm2 = vcmp.gt.f32.partialorder %v2782_v54, 0.0  ;;  %v2094_v0 = vld [vmem:[%s3076_s6 + $0x20] sm:$0xff]   ;;  %v2095_v18 = vld [vmem:[%s3076_s6 + $0x28] sm:$0xff]  }
 0x187   : > { %v2145_v12 = vpop.eup %2144  ;;  %v1927_v13 = vadd.f32 -1.0, %v2143_v5  ;;  %v1009_v15 = vmin.f32 %v2785_v57, 0.0  ;;  %v947_v16 = vadd.f32 %v914_v2, %v817_v11  ;;  %v1128_v26 = vsel %vm968_vm9, %v2734_v14, %v1925_v6  ;;  %v2096_v32 = vld [vmem:[%s3076_s6 + $0x30] sm:$0xff]   ;;  %v2097_v2 = vld [vmem:[%s3076_s6 + $0x38] sm:$0xff]  }
 0x188   : > { %v1928_v17 = vadd.f32 -1.0, %v2145_v12  ;;  %v1068_v19 = vmul.f32 1.442695, %v1008_v27  ;;  %v1010_v20 = vmin.f32 %v2788_v9, 0.0  ;;  %v1129_v22 = vsel %vm969_vm10, %v2737_v10, %v1926_v8  ;;  %v1196_v8 = vpop.permute.xlu1 %1195 }
 0x189   : > { %v1070_v63 = vmul.f32 1.442695, %v1009_v15  ;;  %v1011_v21 = vmin.f32 %v947_v16, 0.0  ;;  %v1130_v28 = vsel %vm970_vm11, %v2740_v1, %v1927_v13  ;;  %vm978_vm3 = vcmp.gt.f32.partialorder %v2788_v9, 0.0 }
 0x18a   : > { %2154 = vpow2.f32 %v1068_v19  ;;  %v1072_v23 = vmul.f32 1.442695, %v1010_v20  ;;  %v1131_v25 = vsel %vm971_vm12, %v2744_v7, %v1928_v17  ;;  %v1166_v30 = vpack.c.bf16 %v1130_v28, %v1128_v26 }
 0x18b   : > { %2156 = vpow2.f32 %v1070_v63  ;;  %v1074_v60 = vmul.f32 1.442695, %v1011_v21  ;;  %v1167_v62 = vpack.c.bf16 %v1131_v25, %v1129_v22  ;;  %vm977_vm4 = vcmp.gt.f32.partialorder %v2785_v57, 0.0 }
 0x18c   : > { %v2147_v29 = vpop.eup %2146  ;;  %2158 = vpow2.f32 %v1072_v23  ;;  %vm979_vm5 = vcmp.gt.f32.partialorder %v947_v16, 0.0 }
 0x18d   : > { %v2149_v31 = vpop.eup %2148  ;;  %v1929_v33 = vadd.f32 -1.0, %v2147_v29  ;;  %2160 = vpow2.f32 %v1074_v60  ;;  %1326 = vmatprep.subr.bf16.mxu1 %v1167_v62  ;;  %v1206_v60 = vpop.permute.xlu1 %1205 }
 0x18e   : > { %v2151_v10 = vpop.eup %2150  ;;  %v1930_v55 = vadd.f32 -1.0, %v2149_v31  ;;  %1327 = vmatpush1.bf16.msra.mxu1 %v1166_v30 }
 0x18f   : > { %v2153_v7 = vpop.eup %2152  ;;  %v1931_v36 = vadd.f32 -1.0, %v2151_v10  ;;  %v1132_v1 = vsel %vm972_vm13, %v2758_v44, %v1929_v33 }
 0x190   : > { %v1932_v14 = vadd.f32 -1.0, %v2153_v7  ;;  %v1133_v39 = vsel %vm973_vm15, %v2761_v45, %v1930_v55 }
 0x191   : > { %v1134_v38 = vsel %vm974_vm14, %v2764_v35, %v1931_v36 }
 0x192   : > { %v1135_v41 = vsel %vm975_vm1, %v2768_v42, %v1932_v14  ;;  %v1168_v43 = vpack.c.bf16 %v1134_v38, %v1132_v1 }
 0x193   : > { %v1169_v37 = vpack.c.bf16 %v1135_v41, %v1133_v39 }
 0x194   : > { %v2155_v46 = vpop.eup %2154 }
 0x195   : > { %v2157_v49 = vpop.eup %2156  ;;  %v1933_v50 = vadd.f32 -1.0, %v2155_v46  ;;  %1328 = vmatprep.subr.bf16.mxu1 %v1169_v37 }
 0x196   : > { %v2159_v34 = vpop.eup %2158  ;;  %v1934_v51 = vadd.f32 -1.0, %v2157_v49  ;;  %1329 = vmatpush1.bf16.msra.mxu1 %v1168_v43 }
 0x197   : > { %v2161_v52 = vpop.eup %2160  ;;  %v1935_v53 = vadd.f32 -1.0, %v2159_v34  ;;  %v1136_v45 = vsel %vm976_vm2, %v2782_v54, %v1933_v50  ;;  %v2093_v54 = vld [vmem:[%s3076_s6 + $0x18] sm:$0xff]   ;;  %v1216_v50 = vpop.permute.xlu1 %1215 }
 0x198   : > { %v1936_v44 = vadd.f32 -1.0, %v2161_v52  ;;  %v1137_v42 = vsel %vm977_vm4, %v2785_v57, %v1934_v51  ;;  %v1191_v57 = vpop.permute.xlu0 %1190 }
 0x199   : > { %v1138_v35 = vsel %vm978_vm3, %v2788_v9, %v1935_v53 }
 0x19a   : > { %v1139_v40 = vsel %vm979_vm5, %v947_v16, %v1936_v44  ;;  %v1170_v24 = vpack.c.bf16 %v1138_v35, %v1136_v45 }
 0x19b   : > { %v1171_v56 = vpack.c.bf16 %v1139_v40, %v1137_v42 }
 0x19c   : > { %v1201_v21 = vpop.permute.xlu0 %1200 }
 0x19d   : > { %1330 = vmatprep.subr.bf16.mxu1 %v1171_v56 }
 0x19e   : > { %1331 = vmatpush1.bf16.msra.mxu1 %v1170_v24 }
 0x1a0   : > { %v1211_v38 = vpop.permute.xlu0 %1210 }
 0x1a1   : > { %1349 = vmatmul.mubr.bf16.vlgmr.msra.gmra.mrb[0].mxu1 %v2090_v58 }
 0x1a2   : > { %1358 = vmatprep.mubr.bf16.mxu1 %v2311_v4 }
 0x1a9   : > { %1359 = vmatmul.mubr.bf16.gmra.mrb[4].mxu1 %v2091_v59 }
 0x1aa   : > { %1368 = vmatprep.mubr.bf16.mxu1 %v2311_v4 }
 0x1b1   : > { %1369 = vmatmul.mubr.bf16.gmra.mrb[8].mxu1 %v2092_v61 }
 0x1b2   : > { %1378 = vmatprep.mubr.bf16.mxu1 %v2311_v4 }
 0x1b9   : > { %1379 = vmatmul.mubr.bf16.gmra.mrb[12].mxu1 %v2093_v54 }
 0x1ba   : > { %1388 = vmatprep.mubr.bf16.mxu1 %v2311_v4 }
 0x1c1   : > { %1389 = vmatmul.mubr.bf16.gmra.mrb[16].mxu1 %v2094_v0 }
 0x1c2   : > { %1398 = vmatprep.mubr.bf16.mxu1 %v2311_v4 }
 0x1c9   : > { %1399 = vmatmul.mubr.bf16.gmra.mrb[20].mxu1 %v2095_v18 }
 0x1ca   : > { %1408 = vmatprep.mubr.bf16.mxu1 %v2311_v4 }
 0x1d1   : > { %1409 = vmatmul.mubr.bf16.gmra.mrb[24].mxu1 %v2096_v32 }
 0x1d2   : > { %1418 = vmatprep.mubr.bf16.mxu1 %v2311_v4 }
 0x1d9   : > { %1419 = vmatmul.mubr.bf16.gmra.mrb[28].mxu1 %v2097_v2 }
 0x1da   : > { %1676 = vmatprep.mubr.bf16.mxu1 %v2311_v4 }
 0x274   : > { %v1350_v3 = vpop.f32.mrb[0].mxu1 }
 0x275   : > { %v2847_v5 = vadd.f32 %v1350_v3, %v1191_v57  ;;  %v1352_v6 = vpop.f32.mrb[1].mxu1 }
 0x276   : > { %v2849_v27 = vadd.f32 %v1352_v6, %v1191_v57  ;;  %v1354_v9 = vpop.f32.mrb[2].mxu1 }
 0x277   : > { %v1461_v11 = vmin.f32 %v2847_v5, 0.0  ;;  %v2852_v12 = vadd.f32 %v1354_v9, %v1196_v8  ;;  %v1356_v13 = vpop.f32.mrb[3].mxu1  ;;  %vm1429_vm6 = vcmp.gt.f32.partialorder %v2847_v5, 0.0 }
 0x278   : > { %v1462_v15 = vmin.f32 %v2849_v27, 0.0  ;;  %v2855_v16 = vadd.f32 %v1356_v13, %v1196_v8  ;;  %vm1430_vm7 = vcmp.gt.f32.partialorder %v2849_v27, 0.0  ;;  %v1221_v8 = vpop.permute.xlu0 %1220 }
 0x279   : > { %v1493_v17 = vmul.f32 1.442695, %v1461_v11  ;;  %v1463_v4 = vmin.f32 %v2852_v12, 0.0  ;;  %vm1431_vm8 = vcmp.gt.f32.partialorder %v2852_v12, 0.0 }
 0x27a   : > { %v1495_v19 = vmul.f32 1.442695, %v1462_v15  ;;  %v1464_v20 = vmin.f32 %v2855_v16, 0.0  ;;  %vm1432_vm9 = vcmp.gt.f32.partialorder %v2855_v16, 0.0 }
 0x27b   : > { %2162 = vpow2.f32 %v1493_v17  ;;  %v1497_v63 = vmul.f32 1.442695, %v1463_v4  ;;  %v1226_v4 = vpop.permute.xlu1 %1225 }
 0x27c   : > { %2164 = vpow2.f32 %v1495_v19  ;;  %v1499_v22 = vmul.f32 1.442695, %v1464_v20  ;;  %v1360_v23 = vpop.f32.mrb[4].mxu1 }
 0x27d   : > { %2166 = vpow2.f32 %v1497_v63  ;;  %v2859_v25 = vadd.f32 %v1360_v23, %v1201_v21  ;;  %v1362_v26 = vpop.f32.mrb[5].mxu1 }
 0x27e   : > { %2168 = vpow2.f32 %v1499_v22  ;;  %v2861_v62 = vadd.f32 %v1362_v26, %v1201_v21  ;;  %v1364_v28 = vpop.f32.mrb[6].mxu1 }
 0x27f   : > { %v1465_v29 = vmin.f32 %v2859_v25, 0.0  ;;  %v2864_v30 = vadd.f32 %v1364_v28, %v1206_v60  ;;  %v1366_v31 = vpop.f32.mrb[7].mxu1  ;;  %vm1433_vm10 = vcmp.gt.f32.partialorder %v2859_v25, 0.0 }
 0x280   : > { %v1466_v33 = vmin.f32 %v2861_v62, 0.0  ;;  %v2867_v10 = vadd.f32 %v1366_v31, %v1206_v60  ;;  %vm1434_vm11 = vcmp.gt.f32.partialorder %v2861_v62, 0.0 }
 0x281   : > { %v1501_v55 = vmul.f32 1.442695, %v1465_v29  ;;  %v1467_v7 = vmin.f32 %v2864_v30, 0.0  ;;  %vm1435_vm12 = vcmp.gt.f32.partialorder %v2864_v30, 0.0 }
 0x282   : > { %v1503_v36 = vmul.f32 1.442695, %v1466_v33  ;;  %v1468_v14 = vmin.f32 %v2867_v10, 0.0  ;;  %vm1436_vm13 = vcmp.gt.f32.partialorder %v2867_v10, 0.0 }
 0x283   : > { %2170 = vpow2.f32 %v1501_v55  ;;  %v1505_v1 = vmul.f32 1.442695, %v1467_v7 }
 0x284   : > { %2172 = vpow2.f32 %v1503_v36  ;;  %v1507_v39 = vmul.f32 1.442695, %v1468_v14  ;;  %v1370_v41 = vpop.f32.mrb[8].mxu1 }
 0x285   : > { %v2163_v43 = vpop.eup %2162  ;;  %2174 = vpow2.f32 %v1505_v1  ;;  %v2871_v37 = vadd.f32 %v1370_v41, %v1211_v38  ;;  %v1372_v46 = vpop.f32.mrb[9].mxu1 }
 0x286   : > { %v2165_v49 = vpop.eup %2164  ;;  %v1945_v34 = vadd.f32 -1.0, %v2163_v43  ;;  %2176 = vpow2.f32 %v1507_v39  ;;  %v2874_v51 = vadd.f32 %v1372_v46, %v1211_v38  ;;  %v1374_v52 = vpop.f32.mrb[10].mxu1 }
 0x287   : > { %v2167_v53 = vpop.eup %2166  ;;  %v1946_v44 = vadd.f32 -1.0, %v2165_v49  ;;  %v1469_v45 = vmin.f32 %v2871_v37, 0.0  ;;  %v2878_v35 = vadd.f32 %v1374_v52, %v1216_v50  ;;  %v1376_v42 = vpop.f32.mrb[11].mxu1  ;;  %vm1437_vm14 = vcmp.gt.f32.partialorder %v2871_v37, 0.0 }
 0x288   : > { %v2169_v40 = vpop.eup %2168  ;;  %v1947_v24 = vadd.f32 -1.0, %v2167_v53  ;;  %v1470_v56 = vmin.f32 %v2874_v51, 0.0  ;;  %v1589_v58 = vsel %vm1429_vm6, %v2847_v5, %v1945_v34  ;;  %v2888_v32 = vadd.f32 %v1376_v42, %v1216_v50 }
 0x289   : > { %v1948_v59 = vadd.f32 -1.0, %v2169_v40  ;;  %v1509_v61 = vmul.f32 1.442695, %v1469_v45  ;;  %v1471_v54 = vmin.f32 %v2878_v35, 0.0  ;;  %v1590_v2 = vsel %vm1430_vm7, %v2849_v27, %v1946_v44  ;;  %v1236_v44 = vpop.permute.xlu1 %1235 }
 0x28a   : > { %v1591_v0 = vsel %vm1431_vm8, %v2852_v12, %v1947_v24  ;;  %v1511_v18 = vmul.f32 1.442695, %v1470_v56  ;;  %v1472_v5 = vmin.f32 %v2888_v32, 0.0  ;;  %vm1439_vm15 = vcmp.gt.f32.partialorder %v2878_v35, 0.0 }
 0x28b   : > { %v1622_v57 = vpack.c.bf16 %v1591_v0, %v1589_v58  ;;  %2178 = vpow2.f32 %v1509_v61  ;;  %v1513_v3 = vmul.f32 1.442695, %v1471_v54  ;;  %v1592_v6 = vsel %vm1432_vm9, %v2855_v16, %v1948_v59 }
 0x28c   : > { %2180 = vpow2.f32 %v1511_v18  ;;  %v1380_v9 = vpop.f32.mrb[12].mxu1  ;;  %v1623_v11 = vpack.c.bf16 %v1592_v6, %v1590_v2  ;;  %v1515_v19 = vmul.f32 1.442695, %v1472_v5  ;;  %vm1438_vm1 = vcmp.gt.f32.partialorder %v2874_v51, 0.0 }
 0x28d   : > { %v2171_v13 = vpop.eup %2170  ;;  %2182 = vpow2.f32 %v1513_v3  ;;  %v2895_v12 = vadd.f32 %v1380_v9, %v1221_v8  ;;  %v1382_v15 = vpop.f32.mrb[13].mxu1  ;;  %vm1440_vm2 = vcmp.gt.f32.partialorder %v2888_v32, 0.0 }
 0x28e   : > { %v2173_v17 = vpop.eup %2172  ;;  %v1949_v27 = vadd.f32 -1.0, %v2171_v13  ;;  %v2898_v20 = vadd.f32 %v1382_v15, %v1221_v8  ;;  %v1384_v16 = vpop.f32.mrb[14].mxu1  ;;  %1644 = vmatprep.subr.bf16.mxu1 %v1623_v11  ;;  %2184 = vpow2.f32 %v1515_v19 }
 0x28f   : > { %v2175_v63 = vpop.eup %2174  ;;  %v1950_v21 = vadd.f32 -1.0, %v2173_v17  ;;  %v1473_v22 = vmin.f32 %v2895_v12, 0.0  ;;  %v2902_v23 = vadd.f32 %v1384_v16, %v1226_v4  ;;  %v1386_v26 = vpop.f32.mrb[15].mxu1  ;;  %1645 = vmatpush1.bf16.msra.mxu1 %v1622_v57  ;;  %vm1441_vm3 = vcmp.gt.f32.partialorder %v2895_v12, 0.0 }
 0x290   : > { %v2177_v60 = vpop.eup %2176  ;;  %v1951_v28 = vadd.f32 -1.0, %v2175_v63  ;;  %v1593_v29 = vsel %vm1433_vm10, %v2859_v25, %v1949_v27  ;;  %v1474_v55 = vmin.f32 %v2898_v20, 0.0  ;;  %v2912_v14 = vadd.f32 %v1386_v26, %v1226_v4  ;;  %v1231_v25 = vpop.permute.xlu0 %1230 }
 0x291   : > { %v1952_v31 = vadd.f32 -1.0, %v2177_v60  ;;  %v1517_v33 = vmul.f32 1.442695, %v1473_v22  ;;  %v1475_v36 = vmin.f32 %v2902_v23, 0.0  ;;  %v1594_v1 = vsel %vm1434_vm11, %v2861_v62, %v1950_v21  ;;  %v1246_v16 = vpop.permute.xlu1 %1245 }
 0x292   : > { %v1595_v7 = vsel %vm1435_vm12, %v2864_v30, %v1951_v28  ;;  %v1519_v39 = vmul.f32 1.442695, %v1474_v55  ;;  %v1476_v46 = vmin.f32 %v2912_v14, 0.0  ;;  %vm1442_vm4 = vcmp.gt.f32.partialorder %v2898_v20, 0.0 }
 0x293   : > { %v1624_v38 = vpack.c.bf16 %v1595_v7, %v1593_v29  ;;  %2186 = vpow2.f32 %v1517_v33  ;;  %v1596_v41 = vsel %vm1436_vm13, %v2867_v10, %v1952_v31  ;;  %v1521_v43 = vmul.f32 1.442695, %v1475_v36 }
 0x294   : > { %v1390_v49 = vpop.f32.mrb[16].mxu1  ;;  %v1625_v50 = vpack.c.bf16 %v1596_v41, %v1594_v1  ;;  %2188 = vpow2.f32 %v1519_v39  ;;  %v1523_v62 = vmul.f32 1.442695, %v1476_v46  ;;  %v1241_v11 = vpop.permute.xlu0 %1240  ;;  %vm1443_vm5 = vcmp.gt.f32.partialorder %v2902_v23, 0.0 }
 0x295   : > { %v2179_v30 = vpop.eup %2178  ;;  %v2919_v34 = vadd.f32 %v1390_v49, %v1231_v25  ;;  %v1392_v52 = vpop.f32.mrb[17].mxu1  ;;  %2190 = vpow2.f32 %v1521_v43  ;;  %vm1444_vm6 = vcmp.gt.f32.partialorder %v2912_v14, 0.0 }
 0x296   : > { %v2181_v53 = vpop.eup %2180  ;;  %v1953_v45 = vadd.f32 -1.0, %v2179_v30  ;;  %v2921_v42 = vadd.f32 %v1392_v52, %v1231_v25  ;;  %v1394_v40 = vpop.f32.mrb[18].mxu1  ;;  %1646 = vmatprep.subr.bf16.mxu1 %v1625_v50  ;;  %2192 = vpow2.f32 %v1523_v62 }
 0x297   : > { %v2183_v10 = vpop.eup %2182  ;;  %v1477_v24 = vmin.f32 %v2919_v34, 0.0  ;;  %v2924_v56 = vadd.f32 %v1394_v40, %v1236_v44  ;;  %v1396_v58 = vpop.f32.mrb[19].mxu1  ;;  %1647 = vmatpush1.bf16.msra.mxu1 %v1624_v38  ;;  %v1954_v61 = vadd.f32 -1.0, %v2181_v53  ;;  %vm1445_vm7 = vcmp.gt.f32.partialorder %v2919_v34, 0.0 }
 0x298   : > { %v1955_v59 = vadd.f32 -1.0, %v2183_v10  ;;  %v1478_v0 = vmin.f32 %v2921_v42, 0.0  ;;  %v2185_v2 = vpop.eup %2184  ;;  %v1597_v57 = vsel %vm1437_vm14, %v2871_v37, %v1953_v45  ;;  %v2932_v6 = vadd.f32 %v1396_v58, %v1236_v44  ;;  %v1251_v49 = vpop.permute.xlu0 %1250 }
 0x299   : > { %v1525_v54 = vmul.f32 1.442695, %v1477_v24  ;;  %v1479_v18 = vmin.f32 %v2924_v56, 0.0  ;;  %v1956_v5 = vadd.f32 -1.0, %v2185_v2  ;;  %v1598_v27 = vsel %vm1438_vm1, %v2874_v51, %v1954_v61  ;;  %v1256_v40 = vpop.permute.xlu1 %1255 }
 0x29a   : > { %v1599_v3 = vsel %vm1439_vm15, %v2878_v35, %v1955_v59  ;;  %v1527_v9 = vmul.f32 1.442695, %v1478_v0  ;;  %v1480_v15 = vmin.f32 %v2932_v6, 0.0  ;;  %vm1446_vm8 = vcmp.gt.f32.partialorder %v2921_v42, 0.0 }
 0x29b   : > { %v1626_v8 = vpack.c.bf16 %v1599_v3, %v1597_v57  ;;  %2194 = vpow2.f32 %v1525_v54  ;;  %v1529_v13 = vmul.f32 1.442695, %v1479_v18  ;;  %v1600_v19 = vsel %vm1440_vm2, %v2888_v32, %v1956_v5 }
 0x29c   : > { %v1400_v17 = vpop.f32.mrb[20].mxu1  ;;  %2196 = vpow2.f32 %v1527_v9  ;;  %v1531_v21 = vmul.f32 1.442695, %v1480_v15  ;;  %v1627_v31 = vpack.c.bf16 %v1600_v19, %v1598_v27  ;;  %vm1447_vm9 = vcmp.gt.f32.partialorder %v2924_v56, 0.0 }
 0x29d   : > { %v2187_v4 = vpop.eup %2186  ;;  %v2937_v37 = vadd.f32 %v1400_v17, %v1241_v11  ;;  %v1402_v35 = vpop.f32.mrb[21].mxu1  ;;  %2198 = vpow2.f32 %v1529_v13  ;;  %vm1448_vm10 = vcmp.gt.f32.partialorder %v2932_v6, 0.0 }
 0x29e   : > { %v1957_v63 = vadd.f32 -1.0, %v2187_v4  ;;  %v2941_v22 = vadd.f32 %v1402_v35, %v1241_v11  ;;  %v1404_v26 = vpop.f32.mrb[22].mxu1  ;;  %v2189_v60 = vpop.eup %2188  ;;  %2200 = vpow2.f32 %v1531_v21  ;;  %1648 = vmatprep.subr.bf16.mxu1 %v1627_v31 }
 0x29f   : > { %v1481_v28 = vmin.f32 %v2937_v37, 0.0  ;;  %v2944_v29 = vadd.f32 %v1404_v26, %v1246_v16  ;;  %v1406_v33 = vpop.f32.mrb[23].mxu1  ;;  %v2191_v55 = vpop.eup %2190  ;;  %v1958_v51 = vadd.f32 -1.0, %v2189_v60  ;;  %1649 = vmatpush1.bf16.msra.mxu1 %v1626_v8  ;;  %vm1449_vm11 = vcmp.gt.f32.partialorder %v2937_v37, 0.0 }
 0x2a0   : > { %v1959_v32 = vadd.f32 -1.0, %v2191_v55  ;;  %v1482_v36 = vmin.f32 %v2941_v22, 0.0  ;;  %v2193_v1 = vpop.eup %2192  ;;  %v1601_v38 = vsel %vm1441_vm3, %v2895_v12, %v1957_v63  ;;  %v2952_v41 = vadd.f32 %v1406_v33, %v1246_v16  ;;  %v1261_v35 = vpop.permute.xlu0 %1260 }
 0x2a1   : > { %v1533_v7 = vmul.f32 1.442695, %v1481_v28  ;;  %v1483_v39 = vmin.f32 %v2944_v29, 0.0  ;;  %v1960_v43 = vadd.f32 -1.0, %v2193_v1  ;;  %v1266_v28 = vpop.permute.xlu1 %1265  ;;  %vm1450_vm12 = vcmp.gt.f32.partialorder %v2941_v22, 0.0 }
 0x2a2   : > { %v1603_v25 = vsel %vm1443_vm5, %v2902_v23, %v1959_v32  ;;  %v1535_v46 = vmul.f32 1.442695, %v1482_v36  ;;  %v1484_v52 = vmin.f32 %v2952_v41, 0.0  ;;  %v1602_v23 = vsel %vm1442_vm4, %v2898_v20, %v1958_v51 }
 0x2a3   : > { %2202 = vpow2.f32 %v1533_v7  ;;  %v1628_v50 = vpack.c.bf16 %v1603_v25, %v1601_v38  ;;  %v1537_v30 = vmul.f32 1.442695, %v1483_v39  ;;  %v1604_v62 = vsel %vm1444_vm6, %v2912_v14, %v1960_v43 }
 0x2a4   : > { %v1410_v12 = vpop.f32.mrb[24].mxu1  ;;  %2204 = vpow2.f32 %v1535_v46  ;;  %v1539_v24 = vmul.f32 1.442695, %v1484_v52  ;;  %v1629_v18 = vpack.c.bf16 %v1604_v62, %v1602_v23  ;;  %vm1451_vm13 = vcmp.gt.f32.partialorder %v2944_v29, 0.0 }
 0x2a5   : > { %v2195_v53 = vpop.eup %2194  ;;  %v2957_v44 = vadd.f32 %v1410_v12, %v1251_v49  ;;  %v1412_v45 = vpop.f32.mrb[25].mxu1  ;;  %2206 = vpow2.f32 %v1537_v30  ;;  %vm1452_vm14 = vcmp.gt.f32.partialorder %v2952_v41, 0.0 }
 0x2a6   : > { %v1961_v10 = vadd.f32 -1.0, %v2195_v53  ;;  %v2963_v58 = vadd.f32 %v1412_v45, %v1251_v49  ;;  %v1414_v59 = vpop.f32.mrb[26].mxu1  ;;  %v2197_v61 = vpop.eup %2196  ;;  %2208 = vpow2.f32 %v1539_v24  ;;  %1650 = vmatprep.subr.bf16.mxu1 %v1629_v18 }
 0x2a7   : > { %v1485_v54 = vmin.f32 %v2957_v44, 0.0  ;;  %v2966_v0 = vadd.f32 %v1414_v59, %v1256_v40  ;;  %v1416_v2 = vpop.f32.mrb[27].mxu1  ;;  %v2199_v57 = vpop.eup %2198  ;;  %v1962_v20 = vadd.f32 -1.0, %v2197_v61  ;;  %1651 = vmatpush1.bf16.msra.mxu1 %v1628_v50  ;;  %vm1453_vm15 = vcmp.gt.f32.partialorder %v2957_v44, 0.0 }
 0x2a8   : > { %v1963_v14 = vadd.f32 -1.0, %v2199_v57  ;;  %v1486_v8 = vmin.f32 %v2963_v58, 0.0  ;;  %v2201_v5 = vpop.eup %2200  ;;  %v1605_v9 = vsel %vm1445_vm7, %v2919_v34, %v1961_v10  ;;  %v2974_v13 = vadd.f32 %v1416_v2, %v1256_v40 }
 0x2a9   : > { %v1541_v3 = vmul.f32 1.442695, %v1485_v54  ;;  %v1487_v11 = vmin.f32 %v2966_v0, 0.0  ;;  %v1964_v17 = vadd.f32 -1.0, %v2201_v5  ;;  %vm1455_vm1 = vcmp.gt.f32.partialorder %v2966_v0, 0.0 }
 0x2aa   : > { %v1607_v15 = vsel %vm1447_vm9, %v2924_v56, %v1963_v14  ;;  %v1543_v4 = vmul.f32 1.442695, %v1486_v8  ;;  %v1488_v16 = vmin.f32 %v2974_v13, 0.0  ;;  %v1606_v56 = vsel %vm1446_vm8, %v2921_v42, %v1962_v20 }
 0x2ab   : > { %2210 = vpow2.f32 %v1541_v3  ;;  %v1630_v27 = vpack.c.bf16 %v1607_v15, %v1605_v9  ;;  %v1545_v19 = vmul.f32 1.442695, %v1487_v11  ;;  %v1608_v60 = vsel %vm1448_vm10, %v2932_v6, %v1964_v17 }
 0x2ac   : > { %v1420_v34 = vpop.f32.mrb[28].mxu1  ;;  %2212 = vpow2.f32 %v1543_v4  ;;  %v1547_v33 = vmul.f32 1.442695, %v1488_v16  ;;  %v1631_v1 = vpack.c.bf16 %v1608_v60, %v1606_v56  ;;  %vm1454_vm2 = vcmp.gt.f32.partialorder %v2963_v58, 0.0 }
 0x2ad   : > { %v2203_v63 = vpop.eup %2202  ;;  %v2979_v21 = vadd.f32 %v1420_v34, %v1261_v35  ;;  %v1422_v26 = vpop.f32.mrb[29].mxu1  ;;  %2214 = vpow2.f32 %v1545_v19  ;;  %vm1456_vm3 = vcmp.gt.f32.partialorder %v2974_v13, 0.0 }
 0x2ae   : > { %v1965_v31 = vadd.f32 -1.0, %v2203_v63  ;;  %v2985_v55 = vadd.f32 %v1422_v26, %v1261_v35  ;;  %v1424_v51 = vpop.f32.mrb[30].mxu1  ;;  %v2205_v32 = vpop.eup %2204  ;;  %2216 = vpow2.f32 %v1547_v33  ;;  %1652 = vmatprep.subr.bf16.mxu1 %v1631_v1  ;;  %v1621_v63 = vld [vmem:[%s3078_s8] sm:$0x1] }
 0x2af   : > { %v1489_v7 = vmin.f32 %v2979_v21, 0.0  ;;  %v2988_v36 = vadd.f32 %v1424_v51, %v1266_v28  ;;  %v1426_v38 = vpop.f32.mrb[31].mxu1  ;;  %v2207_v39 = vpop.eup %2206  ;;  %v1966_v42 = vadd.f32 -1.0, %v2205_v32  ;;  %1653 = vmatpush1.bf16.msra.mxu1 %v1630_v27  ;;  %vm1457_vm4 = vcmp.gt.f32.partialorder %v2979_v21, 0.0 }
 0x2b0   : > { %v1967_v6 = vadd.f32 -1.0, %v2207_v39  ;;  %v1490_v43 = vmin.f32 %v2985_v55, 0.0  ;;  %v2209_v46 = vpop.eup %2208  ;;  %v1609_v49 = vsel %vm1449_vm11, %v2937_v37, %v1965_v31  ;;  %v1427_v30 = vadd.f32 %v1426_v38, %v1266_v28 }
 0x2b1   : > { %v1549_v25 = vmul.f32 1.442695, %v1489_v7  ;;  %v1491_v50 = vmin.f32 %v2988_v36, 0.0  ;;  %v1968_v12 = vadd.f32 -1.0, %v2209_v46  ;;  %v1610_v37 = vsel %vm1450_vm12, %v2941_v22, %v1966_v42 }
 0x2b2   : > { %v1611_v52 = vsel %vm1451_vm13, %v2944_v29, %v1967_v6  ;;  %v1551_v53 = vmul.f32 1.442695, %v1490_v43  ;;  %v1492_v62 = vmin.f32 %v1427_v30, 0.0  ;;  %vm1459_vm5 = vcmp.gt.f32.partialorder %v2988_v36, 0.0 }
 0x2b3   : > { %2218 = vpow2.f32 %v1549_v25  ;;  %v1632_v45 = vpack.c.bf16 %v1611_v52, %v1609_v49  ;;  %v1553_v23 = vmul.f32 1.442695, %v1491_v50  ;;  %v1612_v10 = vsel %vm1452_vm14, %v2952_v41, %v1968_v12 }
 0x2b4   : > { %2220 = vpow2.f32 %v1551_v53  ;;  %v1555_v24 = vmul.f32 1.442695, %v1492_v62  ;;  %v1633_v59 = vpack.c.bf16 %v1612_v10, %v1610_v37  ;;  %vm1458_vm6 = vcmp.gt.f32.partialorder %v2985_v55, 0.0 }
 0x2b5   : > { %v2211_v40 = vpop.eup %2210  ;;  %2222 = vpow2.f32 %v1553_v23  ;;  %vm1460_vm7 = vcmp.gt.f32.partialorder %v1427_v30, 0.0 }
 0x2b6   : > { %v2213_v29 = vpop.eup %2212  ;;  %v1969_v61 = vadd.f32 -1.0, %v2211_v40  ;;  %2224 = vpow2.f32 %v1555_v24  ;;  %1654 = vmatprep.subr.bf16.mxu1 %v1633_v59 }
 0x2b7   : > { %v2215_v54 = vpop.eup %2214  ;;  %v1970_v18 = vadd.f32 -1.0, %v2213_v29  ;;  %1655 = vmatpush1.bf16.msra.mxu1 %v1632_v45 }
 0x2b8   : > { %v1971_v2 = vadd.f32 -1.0, %v2215_v54  ;;  %v2217_v57 = vpop.eup %2216  ;;  %v1613_v22 = vsel %vm1453_vm15, %v2957_v44, %v1969_v61 }
 0x2b9   : > { %v1972_v20 = vadd.f32 -1.0, %v2217_v57  ;;  %v1614_v8 = vsel %vm1454_vm2, %v2963_v58, %v1970_v18 }
 0x2ba   : > { %v1615_v41 = vsel %vm1455_vm1, %v2966_v0, %v1971_v2 }
 0x2bb   : > { %v1634_v14 = vpack.c.bf16 %v1615_v41, %v1613_v22  ;;  %v1616_v5 = vsel %vm1456_vm3, %v2974_v13, %v1972_v20 }
 0x2bc   : > { %v1635_v9 = vpack.c.bf16 %v1616_v5, %v1614_v8 }
 0x2bd   : > { %v2219_v3 = vpop.eup %2218 }
 0x2be   : > { %v2221_v11 = vpop.eup %2220  ;;  %v1973_v15 = vadd.f32 -1.0, %v2219_v3  ;;  %1656 = vmatprep.subr.bf16.mxu1 %v1635_v9 }
 0x2bf   : > { %v2223_v17 = vpop.eup %2222  ;;  %v1974_v4 = vadd.f32 -1.0, %v2221_v11  ;;  %1657 = vmatpush1.bf16.msra.mxu1 %v1634_v14 }
 0x2c0   : > { %v1975_v44 = vadd.f32 -1.0, %v2223_v17  ;;  %v2225_v0 = vpop.eup %2224  ;;  %v1617_v35 = vsel %vm1457_vm4, %v2979_v21, %v1973_v15  ;;  %v1642_v21 = vpop.permute.xlu0 %1641 }
 0x2c1   : > { %v1976_v27 = vadd.f32 -1.0, %v2225_v0  ;;  %v1618_v19 = vsel %vm1458_vm6, %v2985_v55, %v1974_v4 }
 0x2c2   : > { %v1619_v58 = vsel %vm1459_vm5, %v2988_v36, %v1975_v44 }
 0x2c3   : > { %v1636_v13 = vpack.c.bf16 %v1619_v58, %v1617_v35  ;;  %v1620_v16 = vsel %vm1460_vm7, %v1427_v30, %v1976_v27 }
 0x2c4   : > { %v1637_v34 = vpack.c.bf16 %v1620_v16, %v1618_v19 }
 0x2c6   : > { %1658 = vmatprep.subr.bf16.mxu1 %v1637_v34 }
 0x2c7   : > { %1659 = vmatpush1.bf16.msra.mxu1 %v1636_v13 }
 0x2ca   : > { %1677 = vmatmul.mubr.bf16.vlgmr.msra.gmra.mrb[32].mxu1 %v1621_v63 }
 0x39d   : > { %v1678_v26 = vpop.f32.mrb[32].mxu1 }
 0x39e   : > { %v1679_v56 = vadd.f32 %v1678_v26, %v1642_v21  ;;  %v1680_v60 = vpop.f32.mrb[33].mxu1 }
 0x39f   : > { %v1681_v28 = vadd.f32 %v1680_v60, %v1642_v21  ;;  %v1682_v31 = vpop.f32.mrb[34].mxu1 }
 0x3a0   : > { %v1749_v33 = vrot.slane %v1679_v56, 6  ;;  %v1683_v55 = vpop.f32.mrb[35].mxu1 }
 0x3a1   : > { %v1750_v51 = vrot.slane %v1681_v28, 6 }
 0x3a2   : > { %v1755_v32 = vsel %vm515_vm0, %v2468_v47, %v1749_v33 }
 0x3a3   : > { %v1756_v7 = vsel %vm515_vm0, %v2471_v48, %v1750_v51 }
 0x3a4   : > { %v1759_v36 = vcombine.low %v1755_v32, %v1756_v7 }
 0x3a6   : > { %1761 = vst [vmem:[%s383_s30] sm:$0xff] %v1759_v36 }
 0x3a7   : > { %2254 = shalt.err (!%p2251_p2)
}
 0x3a8   : > { %s2255_s27 = scalar_lea.hbm %s3028_s18, 128  ;;  %s2259_s30 = scalar_lea.hbm %s3080_s10, 256 }
 0x3a9   : > { %p2256_p3 = scmp.ne.s32.totalorder %s3028_s18, %s2255_s27  ;;  %p2260_p8 = scmp.lt.u32.totalorder %s3028_s18, %s3080_s10 }
 0x3aa   : > { %p2261_p11 = scmp.lt.u32.totalorder %s2259_s30, %s2255_s27  ;;  %p2263_p10 = scmp.lt.u32.totalorder %s2255_s27, %s3028_s18 }
 0x3ab   : > { %p2257_p4 = pnand %p2256_p3, %p2407_p5 }
 0x3ac   : > { %p2262_p9 = por %p2261_p11, %p2260_p8 }
 0x3ad   : > { %p2258_p7 = pneg %p2257_p4 }
 0x3ae   : > { %p2264_p12 = por %p2263_p10, %p2262_p9 }
 0x3b0   : > { %p2265_p13 = pnand %p2264_p12, %p2258_p7 }
 0x3b2   : > { %2268 = shalt.err (!%p2265_p13)
}
 0x3b3   : > { %2022 = dma.vmem_to_hbm [thread:$0]  (%p2407_p5), %s3030_s11, 128, %s3028_s18, %s1763_s17  }
 0x3b4 PF: > { %p2034_p0 = scmp.ge.s32.totalorder %s2307_s16, 2  ;;  %s1789_s20 = sand.u32 1, %s2295_s13  }
 0x3b5   : > { %s1790_s21 = scalar_lea.sflag [#allocation3], %s1789_s20 }
 0x3b6   : > { %p2029_p1 = pnand %p2034_p0, %p2411_p6 }
 0x3b8   : > { %2290 = dma.done.wait (!%p2029_p1), %s1790_s21, 128  }
 0x3b9   : > { %2292 = vsyncadd (!%p2029_p1), %s1790_s21, 4294967168  ;;  %p21_p2 = scmp.ge.s32.totalorder %s2394_s19, 4   ;;  %s3086_s13 = smov %s2299_s14 }
 0x3ba   : > { %s3087_s14 = smov %s2303_s15  ;;  %s3088_s15 = smov %s2405_s22 }
 0x3bb   : > { %s3089_s16 = smov %s2394_s19  ;;  %23 = sbr.rel (!%p21_p2) target bundleno = 6 (0x6), region = 103 }
 0x3c2   :  { %1795 = vsyncpa [#allocation3], 1 }
 0x3c3   :  { %1797 = vsyncpa [#allocation3 + $0x1], 1 }
 0x3c4   :  { %1798 = vsyncpa [#allocation4], 1 }
 0x3c5   :  { %1800 = vsyncpa [#allocation4 + $0x1], 1 }

</bundles_post_ra>
